<compile_context>
chip_gen: v7x
topology: tpu7x:2x2x1
jax: 0.10.0
libtpu: 0.0.40
codegen_flags: <defaults>
</compile_context>

<pallas_src>
import functools

import jax
import jax.numpy as jnp
from jax.experimental import pallas as pl
from jax.experimental.pallas import tpu as pltpu

# ----------------------------- config ------------------------------------- #
VOCAB = 100
HIDDEN = 32
N_LAYERS = 2
N_HEADS = 4
HEAD_DIM = HIDDEN // N_HEADS
INTERMEDIATE = 64
MAX_POS = 16
NUM_CLASSES = 4
LN_EPS = 1e-12


# ----------------------------- fused kernel -------------------------------- #
def _bert_fwd_kernel(emb_ref, bias_ref, eg_ref, eb_ref,
                     wqkv_ref, bqkv_ref, wo_ref, bo_ref,
                     ln1g_ref, ln1b_ref, w1_ref, b1_ref,
                     w2_ref, b2_ref, ln2g_ref, ln2b_ref,
                     wc_ref, bc_ref, out_ref,
                     *, n_layers, n_heads, head_dim, batch, seq):
    """Full BERT-encoder forward on VMEM-resident data.

    emb_ref : [B*S, H]   summed word/pos/type embeddings (pre-LayerNorm), f32
    bias_ref: [B, 1, S]  additive attention-mask bias (-1e4 on padding), f32
    weights : stacked over layers; matmul weights in bf16, LN/bias params f32
    out_ref : [B, NUM_CLASSES] classifier logits, f32
    """
    H = n_heads * head_dim
    D = head_dim
    BS = batch * seq

    def layer_norm(x, g, b_):
        mu = jnp.mean(x, axis=-1, keepdims=True)
        var = jnp.mean((x - mu) * (x - mu), axis=-1, keepdims=True)
        return (x - mu) * jax.lax.rsqrt(var + LN_EPS) * g + b_

    # mask bias, replicated per head ONCE (head-major leading order matches the
    # q/k/v head stacking below); hoisted out of the layer loop.
    bias = bias_ref[...]                                           # [B, 1, S]
    bias_all = jnp.concatenate([bias] * n_heads, axis=0)           # [nH*B, 1, S]

    # --- embedding LayerNorm (f32 VPU math, no zeros residual) ---
    h = layer_norm(emb_ref[...].astype(jnp.float32), eg_ref[...], eb_ref[...])

    for l in range(n_layers):                                      # static unroll (L=2)
        # ---- fused QKV projection: one bf16 MXU matmul, f32 acc, SSA result ----
        qkv = jnp.dot(h.astype(jnp.bfloat16), wqkv_ref[l],
                      preferred_element_type=jnp.float32) + bqkv_ref[l]   # [BS, 3H]
        # (1/sqrt(D) is already folded into the Q columns of wqkv/bqkv.)

        # ---- stack heads along the leading axis -> one batched attention ----
        qs = [qkv[:, hd * D:(hd + 1) * D].reshape(batch, seq, D)
              for hd in range(n_heads)]
        ks = [qkv[:, H + hd * D:H + (hd + 1) * D].reshape(batch, seq, D)
              for hd in range(n_heads)]
        vs = [qkv[:, 2 * H + hd * D:2 * H + (hd + 1) * D].reshape(batch, seq, D)
              for hd in range(n_heads)]
        q = jnp.concatenate(qs, axis=0).astype(jnp.bfloat16)       # [nH*B, S, D]
        k = jnp.concatenate(ks, axis=0).astype(jnp.bfloat16)
        v = jnp.concatenate(vs, axis=0).astype(jnp.bfloat16)

        # scores / softmax / context for all (batch, head) pairs in one go
        s = jax.lax.dot_general(q, k, (((2,), (2,)), ((0,), (0,))),
                                preferred_element_type=jnp.float32)  # [nH*B, S, S]
        s = s + bias_all
        s = s - jnp.max(s, axis=-1, keepdims=True)
        p = jnp.exp(s)
        p = p / jnp.sum(p, axis=-1, keepdims=True)                  # exact f32 softmax
        ctx = jax.lax.dot_general(p.astype(jnp.bfloat16), v,
                                  (((2,), (1,)), ((0,), (0,))),
                                  preferred_element_type=jnp.float32)  # [nH*B, S, D]

        # concat heads back along lanes -> single K=H output-projection matmul
        ctx_all = jnp.concatenate(
            [ctx[hd * batch:(hd + 1) * batch].reshape(BS, D) for hd in range(n_heads)],
            axis=-1)                                                 # [BS, H]
        attn = jnp.dot(ctx_all.astype(jnp.bfloat16), wo_ref[l],
                       preferred_element_type=jnp.float32) + bo_ref[l]
        h = layer_norm(attn + h, ln1g_ref[l], ln1b_ref[l])

        # ---- feed-forward (bf16 MXU operands, f32 GELU on VPU/EUP) ----
        ff = jnp.dot(h.astype(jnp.bfloat16), w1_ref[l],
                     preferred_element_type=jnp.float32) + b1_ref[l]
        c = jnp.float32(0.7978845608028654)        # sqrt(2/pi)
        # TODO(synk): HF BERT default GELU is the exact erf form; tanh approx used here.
        ff = 0.5 * ff * (1.0 + jnp.tanh(c * (ff + 0.044715 * ff * ff * ff)))
        ff = jnp.dot(ff.astype(jnp.bfloat16), w2_ref[l],
                     preferred_element_type=jnp.float32) + b2_ref[l]
        h = layer_norm(ff + h, ln2g_ref[l], ln2b_ref[l])

    # ---- pooled = seq_output.mean(axis=1) (reference pools over padded tokens too) ----
    pooled = jnp.mean(h.reshape(batch, seq, H), axis=1)             # [B, H] f32
    # TODO(synk): nn.Dropout(p=0.3) is identity in eval mode; training-mode dropout not applied.
    logits = jnp.dot(pooled.astype(jnp.bfloat16), wc_ref[...],
                     preferred_element_type=jnp.float32) + bc_ref[...]
    out_ref[...] = logits.astype(out_ref.dtype)


# ----------------------------- parameters ---------------------------------- #
def init_params(key):
    def nrm(k, shape, scale=0.02):
        return scale * jax.random.normal(k, shape, dtype=jnp.float32)

    ks = iter(jax.random.split(key, 32))
    L, H, I, C = N_LAYERS, HIDDEN, INTERMEDIATE, NUM_CLASSES
    return {
        "word_emb": nrm(next(ks), (VOCAB, H)),
        "pos_emb": nrm(next(ks), (MAX_POS, H)),
        "type_emb": nrm(next(ks), (2, H)),
        "emb_ln_g": jnp.ones((1, H), jnp.float32),
        "emb_ln_b": jnp.zeros((1, H), jnp.float32),
        # per-layer weights stacked along a leading layer axis (f32 masters)
        "wqkv": nrm(next(ks), (L, H, 3 * H)),
        "bqkv": jnp.zeros((L, 1, 3 * H), jnp.float32),
        "wo": nrm(next(ks), (L, H, H)),
        "bo": jnp.zeros((L, 1, H), jnp.float32),
        "ln1_g": jnp.ones((L, 1, H), jnp.float32),
        "ln1_b": jnp.zeros((L, 1, H), jnp.float32),
        "w1": nrm(next(ks), (L, H, I)),
        "b1": jnp.zeros((L, 1, I), jnp.float32),
        "w2": nrm(next(ks), (L, I, H)),
        "b2": jnp.zeros((L, 1, H), jnp.float32),
        "ln2_g": jnp.ones((L, 1, H), jnp.float32),
        "ln2_b": jnp.zeros((L, 1, H), jnp.float32),
        "cls_w": nrm(next(ks), (H, C)),
        "cls_b": jnp.zeros((1, C), jnp.float32),
    }


# ----------------------------- forward pass -------------------------------- #
def bert_for_sequence_classification(params, input_ids, attention_mask):
    B, S = input_ids.shape
    H = HIDDEN
    bf16 = jnp.bfloat16

    # --- embeddings (data-dependent gather stays in plain JAX/XLA) ---
    # TODO(synk): token_type_ids hard-coded to 0 (matches the reference call signature).
    emb = (jnp.take(params["word_emb"], input_ids, axis=0)
           + params["pos_emb"][:S][None, :, :]
           + params["type_emb"][0][None, None, :]).reshape(B * S, H)

    # additive attention-mask bias, [B, 1, S]
    mask_bias = ((1.0 - attention_mask.astype(jnp.float32)) * -10000.0).reshape(B, 1, S)

    # fold 1/sqrt(head_dim) into the Q columns of the fused QKV weight/bias
    scale = 1.0 / (HEAD_DIM ** 0.5)
    qscale = jnp.concatenate([jnp.full((1, H), scale, jnp.float32),
                              jnp.ones((1, 2 * H), jnp.float32)], axis=-1)  # [1, 3H]
    wqkv = (params["wqkv"] * qscale).astype(bf16)
    bqkv = params["bqkv"] * qscale

    in_arrays = [
        emb, mask_bias,
        params["emb_ln_g"], params["emb_ln_b"],
        wqkv, bqkv,
        params["wo"].astype(bf16), params["bo"],
        params["ln1_g"], params["ln1_b"],
        params["w1"].astype(bf16), params["b1"],
        params["w2"].astype(bf16), params["b2"],
        params["ln2_g"], params["ln2_b"],
        params["cls_w"].astype(bf16), params["cls_b"],
    ]

    kernel = functools.partial(
        _bert_fwd_kernel,
        n_layers=N_LAYERS, n_heads=N_HEADS, head_dim=HEAD_DIM, batch=B, seq=S)

    def full_spec(shape):
        nd = len(shape)
        return pl.BlockSpec(shape, lambda i, _n=nd: (0,) * _n)

    # TODO(synk): at production BERT sizes, replace the single-step grid with a
    # (M_tiles, L) grid: per-layer weight BlockSpecs (index_map lambda m,l:(l,0,0))
    # double-buffered by Pallas, hidden state carried in VMEM scratch, M axis
    # marked "parallel" for v7x's 2 TensorCores, tiles re-derived for the
    # 64 MiB (v7x) vs 128 MiB (v5e/v6e) VMEM budgets, N/K tiles multiples of 256.
    return pl.pallas_call(
        kernel,
        out_shape=jax.ShapeDtypeStruct((B, NUM_CLASSES), jnp.float32),
        grid=(1,),
        in_specs=[full_spec(a.shape) for a in in_arrays],
        out_specs=full_spec((B, NUM_CLASSES)),
        compiler_params=pltpu.CompilerParams(dimension_semantics=("arbitrary",)),
    )(*in_arrays)


# ----------------------------- main ----------------------------------------- #
if __name__ == "__main__":
    B, S = 2, 8
    key = jax.random.PRNGKey(0)
    k_ids, k_params = jax.random.split(key)

    input_ids = jax.random.randint(k_ids, (B, S), 0, VOCAB, dtype=jnp.int32)
    attention_mask = jnp.array(
        [[1, 1, 1, 1, 1, 1, 1, 1],
         [1, 1, 1, 1, 1, 0, 0, 0]], dtype=jnp.int32)

    params = init_params(k_params)

    scores = bert_for_sequence_classification(params, input_ids, attention_mask)
    scores = jax.block_until_ready(scores)
    assert scores.shape == (B, NUM_CLASSES)
    assert bool(jnp.all(jnp.isfinite(scores)))
    print("KERNEL_OK")
</pallas_src>

<mosaic_0001>
module attributes {stable_mosaic.version = 11 : i64} {
  func.func @_bert_fwd_kernel(%arg0: i32, %arg1: memref<16x32xf32, #tpu.memory_space<vmem>>, %arg2: memref<2x1x8xf32, #tpu.memory_space<vmem>>, %arg3: memref<1x32xf32, #tpu.memory_space<vmem>>, %arg4: memref<1x32xf32, #tpu.memory_space<vmem>>, %arg5: memref<2x32x96xbf16, #tpu.memory_space<vmem>>, %arg6: memref<2x1x96xf32, #tpu.memory_space<vmem>>, %arg7: memref<2x32x32xbf16, #tpu.memory_space<vmem>>, %arg8: memref<2x1x32xf32, #tpu.memory_space<vmem>>, %arg9: memref<2x1x32xf32, #tpu.memory_space<vmem>>, %arg10: memref<2x1x32xf32, #tpu.memory_space<vmem>>, %arg11: memref<2x32x64xbf16, #tpu.memory_space<vmem>>, %arg12: memref<2x1x64xf32, #tpu.memory_space<vmem>>, %arg13: memref<2x64x32xbf16, #tpu.memory_space<vmem>>, %arg14: memref<2x1x32xf32, #tpu.memory_space<vmem>>, %arg15: memref<2x1x32xf32, #tpu.memory_space<vmem>>, %arg16: memref<2x1x32xf32, #tpu.memory_space<vmem>>, %arg17: memref<32x4xbf16, #tpu.memory_space<vmem>>, %arg18: memref<1x4xf32, #tpu.memory_space<vmem>>, %arg19: memref<2x4xf32, #tpu.memory_space<vmem>>) attributes {dimension_semantics = [#tpu.dimension_semantics<arbitrary>], iteration_bounds = array<i64: 1>, scalar_prefetch = 0 : i64, scratch_operands = 0 : i64, tpu.core_type = #tpu.core_type<tc>, window_params = [{pipeline_mode = #tpu.pipeline_mode<synchronous>, transform_indices = @transform_0, window_bounds = array<i64: 16, 32>}, {pipeline_mode = #tpu.pipeline_mode<synchronous>, transform_indices = @transform_1, window_bounds = array<i64: 2, 1, 8>}, {pipeline_mode = #tpu.pipeline_mode<synchronous>, transform_indices = @transform_2, window_bounds = array<i64: 1, 32>}, {pipeline_mode = #tpu.pipeline_mode<synchronous>, transform_indices = @transform_3, window_bounds = array<i64: 1, 32>}, {pipeline_mode = #tpu.pipeline_mode<synchronous>, transform_indices = @transform_4, window_bounds = array<i64: 2, 32, 96>}, {pipeline_mode = #tpu.pipeline_mode<synchronous>, transform_indices = @transform_5, window_bounds = array<i64: 2, 1, 96>}, {pipeline_mode = #tpu.pipeline_mode<synchronous>, transform_indices = @transform_6, window_bounds = array<i64: 2, 32, 32>}, {pipeline_mode = #tpu.pipeline_mode<synchronous>, transform_indices = @transform_7, window_bounds = array<i64: 2, 1, 32>}, {pipeline_mode = #tpu.pipeline_mode<synchronous>, transform_indices = @transform_8, window_bounds = array<i64: 2, 1, 32>}, {pipeline_mode = #tpu.pipeline_mode<synchronous>, transform_indices = @transform_9, window_bounds = array<i64: 2, 1, 32>}, {pipeline_mode = #tpu.pipeline_mode<synchronous>, transform_indices = @transform_10, window_bounds = array<i64: 2, 32, 64>}, {pipeline_mode = #tpu.pipeline_mode<synchronous>, transform_indices = @transform_11, window_bounds = array<i64: 2, 1, 64>}, {pipeline_mode = #tpu.pipeline_mode<synchronous>, transform_indices = @transform_12, window_bounds = array<i64: 2, 64, 32>}, {pipeline_mode = #tpu.pipeline_mode<synchronous>, transform_indices = @transform_13, window_bounds = array<i64: 2, 1, 32>}, {pipeline_mode = #tpu.pipeline_mode<synchronous>, transform_indices = @transform_14, window_bounds = array<i64: 2, 1, 32>}, {pipeline_mode = #tpu.pipeline_mode<synchronous>, transform_indices = @transform_15, window_bounds = array<i64: 2, 1, 32>}, {pipeline_mode = #tpu.pipeline_mode<synchronous>, transform_indices = @transform_16, window_bounds = array<i64: 32, 4>}, {pipeline_mode = #tpu.pipeline_mode<synchronous>, transform_indices = @transform_17, window_bounds = array<i64: 1, 4>}, {pipeline_mode = #tpu.pipeline_mode<synchronous>, transform_indices = @transform_18, window_bounds = array<i64: 2, 4>}]} {
    %c0 = arith.constant 0 : index
    %c0_0 = arith.constant 0 : index
    %c0_1 = arith.constant 0 : index
    %0 = vector.load %arg2[%c0, %c0_0, %c0_1] : memref<2x1x8xf32, #tpu.memory_space<vmem>>, vector<2x1x8xf32>
    %1 = tpu.concatenate %0, %0, %0, %0 in 0 : vector<2x1x8xf32>, vector<2x1x8xf32>, vector<2x1x8xf32>, vector<2x1x8xf32> -> vector<8x1x8xf32>
    %c0_2 = arith.constant 0 : index
    %c0_3 = arith.constant 0 : index
    %2 = vector.load %arg1[%c0_2, %c0_3] : memref<16x32xf32, #tpu.memory_space<vmem>>, vector<16x32xf32>
    %c0_4 = arith.constant 0 : index
    %c0_5 = arith.constant 0 : index
    %3 = vector.load %arg3[%c0_4, %c0_5] : memref<1x32xf32, #tpu.memory_space<vmem>>, vector<1x32xf32>
    %c0_6 = arith.constant 0 : index
    %c0_7 = arith.constant 0 : index
    %4 = vector.load %arg4[%c0_6, %c0_7] : memref<1x32xf32, #tpu.memory_space<vmem>>, vector<1x32xf32>
    %cst = arith.constant dense<0.000000e+00> : vector<16xf32>
    %5 = vector.multi_reduction <add>, %2, %cst [1] : vector<16x32xf32> to vector<16xf32>
    %6 = vector.shape_cast %5 : vector<16xf32> to vector<16x1xf32>
    %cst_8 = arith.constant 3.200000e+01 : f32
    %7 = vector.broadcast %cst_8 : f32 to vector<16x1xf32>
    %8 = arith.divf %6, %7 : vector<16x1xf32>
    %9 = vector.broadcast %8 : vector<16x1xf32> to vector<16x32xf32>
    %10 = arith.subf %2, %9 : vector<16x32xf32>
    %11 = vector.broadcast %8 : vector<16x1xf32> to vector<16x32xf32>
    %12 = arith.subf %2, %11 : vector<16x32xf32>
    %13 = arith.mulf %10, %12 : vector<16x32xf32>
    %cst_9 = arith.constant dense<0.000000e+00> : vector<16xf32>
    %14 = vector.multi_reduction <add>, %13, %cst_9 [1] : vector<16x32xf32> to vector<16xf32>
    %15 = vector.shape_cast %14 : vector<16xf32> to vector<16x1xf32>
    %cst_10 = arith.constant 3.200000e+01 : f32
    %16 = vector.broadcast %cst_10 : f32 to vector<16x1xf32>
    %17 = arith.divf %15, %16 : vector<16x1xf32>
    %18 = vector.broadcast %8 : vector<16x1xf32> to vector<16x32xf32>
    %19 = arith.subf %2, %18 : vector<16x32xf32>
    %cst_11 = arith.constant 9.99999996E-13 : f32
    %20 = vector.broadcast %cst_11 : f32 to vector<16x1xf32>
    %21 = arith.addf %17, %20 : vector<16x1xf32>
    %22 = math.rsqrt %21 : vector<16x1xf32>
    %23 = vector.broadcast %22 : vector<16x1xf32> to vector<16x32xf32>
    %24 = arith.mulf %19, %23 : vector<16x32xf32>
    %25 = vector.broadcast %3 : vector<1x32xf32> to vector<16x32xf32>
    %26 = arith.mulf %24, %25 : vector<16x32xf32>
    %27 = vector.broadcast %4 : vector<1x32xf32> to vector<16x32xf32>
    %28 = arith.addf %26, %27 : vector<16x32xf32>
    %29 = arith.truncf %28 : vector<16x32xf32> to vector<16x32xbf16>
    %c0_12 = arith.constant 0 : index
    %c0_13 = arith.constant 0 : index
    %c0_14 = arith.constant 0 : index
    %30 = vector.load %arg5[%c0_12, %c0_13, %c0_14] : memref<2x32x96xbf16, #tpu.memory_space<vmem>>, vector<1x32x96xbf16>
    %31 = vector.shape_cast %30 : vector<1x32x96xbf16> to vector<32x96xbf16>
    %cst_15 = arith.constant dense<0.000000e+00> : vector<16x96xf32>
    %32 = tpu.matmul %29, %31, %cst_15 {dimension_numbers = #tpu.dot_dimension_numbers<[1], [0], [0], [1], [0, 0, 1, 1], [], []>} : vector<16x32xbf16>, vector<32x96xbf16>, vector<16x96xf32> -> vector<16x96xf32>
    %c0_16 = arith.constant 0 : index
    %c0_17 = arith.constant 0 : index
    %c0_18 = arith.constant 0 : index
    %33 = vector.load %arg6[%c0_16, %c0_17, %c0_18] : memref<2x1x96xf32, #tpu.memory_space<vmem>>, vector<1x1x96xf32>
    %34 = vector.shape_cast %33 : vector<1x1x96xf32> to vector<1x96xf32>
    %35 = vector.broadcast %34 : vector<1x96xf32> to vector<16x96xf32>
    %36 = arith.addf %32, %35 : vector<16x96xf32>
    %37 = vector.extract_strided_slice %36 {offsets = [0, 0], sizes = [16, 8], strides = [1, 1]} : vector<16x96xf32> to vector<16x8xf32>
    %38 = vector.shape_cast %37 : vector<16x8xf32> to vector<2x8x8xf32>
    %39 = vector.extract_strided_slice %36 {offsets = [0, 8], sizes = [16, 8], strides = [1, 1]} : vector<16x96xf32> to vector<16x8xf32>
    %40 = vector.shape_cast %39 : vector<16x8xf32> to vector<2x8x8xf32>
    %41 = vector.extract_strided_slice %36 {offsets = [0, 16], sizes = [16, 8], strides = [1, 1]} : vector<16x96xf32> to vector<16x8xf32>
    %42 = vector.shape_cast %41 : vector<16x8xf32> to vector<2x8x8xf32>
    %43 = vector.extract_strided_slice %36 {offsets = [0, 24], sizes = [16, 8], strides = [1, 1]} : vector<16x96xf32> to vector<16x8xf32>
    %44 = vector.shape_cast %43 : vector<16x8xf32> to vector<2x8x8xf32>
    %45 = vector.extract_strided_slice %36 {offsets = [0, 32], sizes = [16, 8], strides = [1, 1]} : vector<16x96xf32> to vector<16x8xf32>
    %46 = vector.shape_cast %45 : vector<16x8xf32> to vector<2x8x8xf32>
    %47 = vector.extract_strided_slice %36 {offsets = [0, 40], sizes = [16, 8], strides = [1, 1]} : vector<16x96xf32> to vector<16x8xf32>
    %48 = vector.shape_cast %47 : vector<16x8xf32> to vector<2x8x8xf32>
    %49 = vector.extract_strided_slice %36 {offsets = [0, 48], sizes = [16, 8], strides = [1, 1]} : vector<16x96xf32> to vector<16x8xf32>
    %50 = vector.shape_cast %49 : vector<16x8xf32> to vector<2x8x8xf32>
    %51 = vector.extract_strided_slice %36 {offsets = [0, 56], sizes = [16, 8], strides = [1, 1]} : vector<16x96xf32> to vector<16x8xf32>
    %52 = vector.shape_cast %51 : vector<16x8xf32> to vector<2x8x8xf32>
    %53 = vector.extract_strided_slice %36 {offsets = [0, 64], sizes = [16, 8], strides = [1, 1]} : vector<16x96xf32> to vector<16x8xf32>
    %54 = vector.shape_cast %53 : vector<16x8xf32> to vector<2x8x8xf32>
    %55 = vector.extract_strided_slice %36 {offsets = [0, 72], sizes = [16, 8], strides = [1, 1]} : vector<16x96xf32> to vector<16x8xf32>
    %56 = vector.shape_cast %55 : vector<16x8xf32> to vector<2x8x8xf32>
    %57 = vector.extract_strided_slice %36 {offsets = [0, 80], sizes = [16, 8], strides = [1, 1]} : vector<16x96xf32> to vector<16x8xf32>
    %58 = vector.shape_cast %57 : vector<16x8xf32> to vector<2x8x8xf32>
    %59 = vector.extract_strided_slice %36 {offsets = [0, 88], sizes = [16, 8], strides = [1, 1]} : vector<16x96xf32> to vector<16x8xf32>
    %60 = vector.shape_cast %59 : vector<16x8xf32> to vector<2x8x8xf32>
    %61 = tpu.concatenate %38, %40, %42, %44 in 0 : vector<2x8x8xf32>, vector<2x8x8xf32>, vector<2x8x8xf32>, vector<2x8x8xf32> -> vector<8x8x8xf32>
    %62 = arith.truncf %61 : vector<8x8x8xf32> to vector<8x8x8xbf16>
    %63 = tpu.concatenate %46, %48, %50, %52 in 0 : vector<2x8x8xf32>, vector<2x8x8xf32>, vector<2x8x8xf32>, vector<2x8x8xf32> -> vector<8x8x8xf32>
    %64 = arith.truncf %63 : vector<8x8x8xf32> to vector<8x8x8xbf16>
    %65 = tpu.concatenate %54, %56, %58, %60 in 0 : vector<2x8x8xf32>, vector<2x8x8xf32>, vector<2x8x8xf32>, vector<2x8x8xf32> -> vector<8x8x8xf32>
    %66 = arith.truncf %65 : vector<8x8x8xf32> to vector<8x8x8xbf16>
    %cst_19 = arith.constant dense<0.000000e+00> : vector<8x8x8xf32>
    %67 = tpu.matmul %62, %64, %cst_19 {dimension_numbers = #tpu.dot_dimension_numbers<[2], [2], [1], [1], [0, 0, 0, 1, 1, 1], [0], [0]>} : vector<8x8x8xbf16>, vector<8x8x8xbf16>, vector<8x8x8xf32> -> vector<8x8x8xf32>
    %68 = vector.broadcast %1 : vector<8x1x8xf32> to vector<8x8x8xf32>
    %69 = arith.addf %67, %68 : vector<8x8x8xf32>
    %cst_20 = arith.constant dense<0xFF800000> : vector<8x8xf32>
    %70 = vector.multi_reduction <maximumf>, %69, %cst_20 [2] : vector<8x8x8xf32> to vector<8x8xf32>
    %71 = vector.shape_cast %70 : vector<8x8xf32> to vector<8x8x1xf32>
    %72 = vector.broadcast %71 : vector<8x8x1xf32> to vector<8x8x8xf32>
    %73 = arith.subf %69, %72 : vector<8x8x8xf32>
    %74 = math.exp %73 : vector<8x8x8xf32>
    %cst_21 = arith.constant dense<0.000000e+00> : vector<8x8xf32>
    %75 = vector.multi_reduction <add>, %74, %cst_21 [2] : vector<8x8x8xf32> to vector<8x8xf32>
    %76 = vector.shape_cast %75 : vector<8x8xf32> to vector<8x8x1xf32>
    %77 = vector.broadcast %76 : vector<8x8x1xf32> to vector<8x8x8xf32>
    %78 = arith.divf %74, %77 : vector<8x8x8xf32>
    %79 = arith.truncf %78 : vector<8x8x8xf32> to vector<8x8x8xbf16>
    %cst_22 = arith.constant dense<0.000000e+00> : vector<8x8x8xf32>
    %80 = tpu.matmul %79, %66, %cst_22 {dimension_numbers = #tpu.dot_dimension_numbers<[2], [1], [1], [2], [0, 0, 0, 1, 1, 2], [0], [0]>} : vector<8x8x8xbf16>, vector<8x8x8xbf16>, vector<8x8x8xf32> -> vector<8x8x8xf32>
    %81 = vector.extract_strided_slice %80 {offsets = [0, 0, 0], sizes = [2, 8, 8], strides = [1, 1, 1]} : vector<8x8x8xf32> to vector<2x8x8xf32>
    %82 = vector.shape_cast %81 : vector<2x8x8xf32> to vector<16x8xf32>
    %83 = vector.extract_strided_slice %80 {offsets = [2, 0, 0], sizes = [2, 8, 8], strides = [1, 1, 1]} : vector<8x8x8xf32> to vector<2x8x8xf32>
    %84 = vector.shape_cast %83 : vector<2x8x8xf32> to vector<16x8xf32>
    %85 = vector.extract_strided_slice %80 {offsets = [4, 0, 0], sizes = [2, 8, 8], strides = [1, 1, 1]} : vector<8x8x8xf32> to vector<2x8x8xf32>
    %86 = vector.shape_cast %85 : vector<2x8x8xf32> to vector<16x8xf32>
    %87 = vector.extract_strided_slice %80 {offsets = [6, 0, 0], sizes = [2, 8, 8], strides = [1, 1, 1]} : vector<8x8x8xf32> to vector<2x8x8xf32>
    %88 = vector.shape_cast %87 : vector<2x8x8xf32> to vector<16x8xf32>
    %89 = tpu.concatenate %82, %84, %86, %88 in 1 : vector<16x8xf32>, vector<16x8xf32>, vector<16x8xf32>, vector<16x8xf32> -> vector<16x32xf32>
    %90 = arith.truncf %89 : vector<16x32xf32> to vector<16x32xbf16>
    %c0_23 = arith.constant 0 : index
    %c0_24 = arith.constant 0 : index
    %c0_25 = arith.constant 0 : index
    %91 = vector.load %arg7[%c0_23, %c0_24, %c0_25] : memref<2x32x32xbf16, #tpu.memory_space<vmem>>, vector<1x32x32xbf16>
    %92 = vector.shape_cast %91 : vector<1x32x32xbf16> to vector<32x32xbf16>
    %cst_26 = arith.constant dense<0.000000e+00> : vector<16x32xf32>
    %93 = tpu.matmul %90, %92, %cst_26 {dimension_numbers = #tpu.dot_dimension_numbers<[1], [0], [0], [1], [0, 0, 1, 1], [], []>} : vector<16x32xbf16>, vector<32x32xbf16>, vector<16x32xf32> -> vector<16x32xf32>
    %c0_27 = arith.constant 0 : index
    %c0_28 = arith.constant 0 : index
    %c0_29 = arith.constant 0 : index
    %94 = vector.load %arg8[%c0_27, %c0_28, %c0_29] : memref<2x1x32xf32, #tpu.memory_space<vmem>>, vector<1x1x32xf32>
    %95 = vector.shape_cast %94 : vector<1x1x32xf32> to vector<1x32xf32>
    %96 = vector.broadcast %95 : vector<1x32xf32> to vector<16x32xf32>
    %97 = arith.addf %93, %96 : vector<16x32xf32>
    %98 = arith.addf %97, %28 : vector<16x32xf32>
    %c0_30 = arith.constant 0 : index
    %c0_31 = arith.constant 0 : index
    %c0_32 = arith.constant 0 : index
    %99 = vector.load %arg9[%c0_30, %c0_31, %c0_32] : memref<2x1x32xf32, #tpu.memory_space<vmem>>, vector<1x1x32xf32>
    %100 = vector.shape_cast %99 : vector<1x1x32xf32> to vector<1x32xf32>
    %c0_33 = arith.constant 0 : index
    %c0_34 = arith.constant 0 : index
    %c0_35 = arith.constant 0 : index
    %101 = vector.load %arg10[%c0_33, %c0_34, %c0_35] : memref<2x1x32xf32, #tpu.memory_space<vmem>>, vector<1x1x32xf32>
    %102 = vector.shape_cast %101 : vector<1x1x32xf32> to vector<1x32xf32>
    %cst_36 = arith.constant dense<0.000000e+00> : vector<16xf32>
    %103 = vector.multi_reduction <add>, %98, %cst_36 [1] : vector<16x32xf32> to vector<16xf32>
    %104 = vector.shape_cast %103 : vector<16xf32> to vector<16x1xf32>
    %cst_37 = arith.constant 3.200000e+01 : f32
    %105 = vector.broadcast %cst_37 : f32 to vector<16x1xf32>
    %106 = arith.divf %104, %105 : vector<16x1xf32>
    %107 = vector.broadcast %106 : vector<16x1xf32> to vector<16x32xf32>
    %108 = arith.subf %98, %107 : vector<16x32xf32>
    %109 = vector.broadcast %106 : vector<16x1xf32> to vector<16x32xf32>
    %110 = arith.subf %98, %109 : vector<16x32xf32>
    %111 = arith.mulf %108, %110 : vector<16x32xf32>
    %cst_38 = arith.constant dense<0.000000e+00> : vector<16xf32>
    %112 = vector.multi_reduction <add>, %111, %cst_38 [1] : vector<16x32xf32> to vector<16xf32>
    %113 = vector.shape_cast %112 : vector<16xf32> to vector<16x1xf32>
    %cst_39 = arith.constant 3.200000e+01 : f32
    %114 = vector.broadcast %cst_39 : f32 to vector<16x1xf32>
    %115 = arith.divf %113, %114 : vector<16x1xf32>
    %116 = vector.broadcast %106 : vector<16x1xf32> to vector<16x32xf32>
    %117 = arith.subf %98, %116 : vector<16x32xf32>
    %cst_40 = arith.constant 9.99999996E-13 : f32
    %118 = vector.broadcast %cst_40 : f32 to vector<16x1xf32>
    %119 = arith.addf %115, %118 : vector<16x1xf32>
    %120 = math.rsqrt %119 : vector<16x1xf32>
    %121 = vector.broadcast %120 : vector<16x1xf32> to vector<16x32xf32>
    %122 = arith.mulf %117, %121 : vector<16x32xf32>
    %123 = vector.broadcast %100 : vector<1x32xf32> to vector<16x32xf32>
    %124 = arith.mulf %122, %123 : vector<16x32xf32>
    %125 = vector.broadcast %102 : vector<1x32xf32> to vector<16x32xf32>
    %126 = arith.addf %124, %125 : vector<16x32xf32>
    %127 = arith.truncf %126 : vector<16x32xf32> to vector<16x32xbf16>
    %c0_41 = arith.constant 0 : index
    %c0_42 = arith.constant 0 : index
    %c0_43 = arith.constant 0 : index
    %128 = vector.load %arg11[%c0_41, %c0_42, %c0_43] : memref<2x32x64xbf16, #tpu.memory_space<vmem>>, vector<1x32x64xbf16>
    %129 = vector.shape_cast %128 : vector<1x32x64xbf16> to vector<32x64xbf16>
    %cst_44 = arith.constant dense<0.000000e+00> : vector<16x64xf32>
    %130 = tpu.matmul %127, %129, %cst_44 {dimension_numbers = #tpu.dot_dimension_numbers<[1], [0], [0], [1], [0, 0, 1, 1], [], []>} : vector<16x32xbf16>, vector<32x64xbf16>, vector<16x64xf32> -> vector<16x64xf32>
    %c0_45 = arith.constant 0 : index
    %c0_46 = arith.constant 0 : index
    %c0_47 = arith.constant 0 : index
    %131 = vector.load %arg12[%c0_45, %c0_46, %c0_47] : memref<2x1x64xf32, #tpu.memory_space<vmem>>, vector<1x1x64xf32>
    %132 = vector.shape_cast %131 : vector<1x1x64xf32> to vector<1x64xf32>
    %133 = vector.broadcast %132 : vector<1x64xf32> to vector<16x64xf32>
    %134 = arith.addf %130, %133 : vector<16x64xf32>
    %cst_48 = arith.constant 5.000000e-01 : f32
    %135 = vector.broadcast %cst_48 : f32 to vector<16x64xf32>
    %136 = arith.mulf %135, %134 : vector<16x64xf32>
    %cst_49 = arith.constant 4.471500e-02 : f32
    %137 = vector.broadcast %cst_49 : f32 to vector<16x64xf32>
    %138 = arith.mulf %137, %134 : vector<16x64xf32>
    %139 = arith.mulf %138, %134 : vector<16x64xf32>
    %140 = arith.mulf %139, %134 : vector<16x64xf32>
    %141 = arith.addf %134, %140 : vector<16x64xf32>
    %cst_50 = arith.constant 0.797884583 : f32
    %142 = vector.broadcast %cst_50 : f32 to vector<16x64xf32>
    %143 = arith.mulf %142, %141 : vector<16x64xf32>
    %144 = math.tanh %143 : vector<16x64xf32>
    %cst_51 = arith.constant 1.000000e+00 : f32
    %145 = vector.broadcast %cst_51 : f32 to vector<16x64xf32>
    %146 = arith.addf %145, %144 : vector<16x64xf32>
    %147 = arith.mulf %136, %146 : vector<16x64xf32>
    %148 = arith.truncf %147 : vector<16x64xf32> to vector<16x64xbf16>
    %c0_52 = arith.constant 0 : index
    %c0_53 = arith.constant 0 : index
    %c0_54 = arith.constant 0 : index
    %149 = vector.load %arg13[%c0_52, %c0_53, %c0_54] : memref<2x64x32xbf16, #tpu.memory_space<vmem>>, vector<1x64x32xbf16>
    %150 = vector.shape_cast %149 : vector<1x64x32xbf16> to vector<64x32xbf16>
    %cst_55 = arith.constant dense<0.000000e+00> : vector<16x32xf32>
    %151 = tpu.matmul %148, %150, %cst_55 {dimension_numbers = #tpu.dot_dimension_numbers<[1], [0], [0], [1], [0, 0, 1, 1], [], []>} : vector<16x64xbf16>, vector<64x32xbf16>, vector<16x32xf32> -> vector<16x32xf32>
    %c0_56 = arith.constant 0 : index
    %c0_57 = arith.constant 0 : index
    %c0_58 = arith.constant 0 : index
    %152 = vector.load %arg14[%c0_56, %c0_57, %c0_58] : memref<2x1x32xf32, #tpu.memory_space<vmem>>, vector<1x1x32xf32>
    %153 = vector.shape_cast %152 : vector<1x1x32xf32> to vector<1x32xf32>
    %154 = vector.broadcast %153 : vector<1x32xf32> to vector<16x32xf32>
    %155 = arith.addf %151, %154 : vector<16x32xf32>
    %156 = arith.addf %155, %126 : vector<16x32xf32>
    %c0_59 = arith.constant 0 : index
    %c0_60 = arith.constant 0 : index
    %c0_61 = arith.constant 0 : index
    %157 = vector.load %arg15[%c0_59, %c0_60, %c0_61] : memref<2x1x32xf32, #tpu.memory_space<vmem>>, vector<1x1x32xf32>
    %158 = vector.shape_cast %157 : vector<1x1x32xf32> to vector<1x32xf32>
    %c0_62 = arith.constant 0 : index
    %c0_63 = arith.constant 0 : index
    %c0_64 = arith.constant 0 : index
    %159 = vector.load %arg16[%c0_62, %c0_63, %c0_64] : memref<2x1x32xf32, #tpu.memory_space<vmem>>, vector<1x1x32xf32>
    %160 = vector.shape_cast %159 : vector<1x1x32xf32> to vector<1x32xf32>
    %cst_65 = arith.constant dense<0.000000e+00> : vector<16xf32>
    %161 = vector.multi_reduction <add>, %156, %cst_65 [1] : vector<16x32xf32> to vector<16xf32>
    %162 = vector.shape_cast %161 : vector<16xf32> to vector<16x1xf32>
    %cst_66 = arith.constant 3.200000e+01 : f32
    %163 = vector.broadcast %cst_66 : f32 to vector<16x1xf32>
    %164 = arith.divf %162, %163 : vector<16x1xf32>
    %165 = vector.broadcast %164 : vector<16x1xf32> to vector<16x32xf32>
    %166 = arith.subf %156, %165 : vector<16x32xf32>
    %167 = vector.broadcast %164 : vector<16x1xf32> to vector<16x32xf32>
    %168 = arith.subf %156, %167 : vector<16x32xf32>
    %169 = arith.mulf %166, %168 : vector<16x32xf32>
    %cst_67 = arith.constant dense<0.000000e+00> : vector<16xf32>
    %170 = vector.multi_reduction <add>, %169, %cst_67 [1] : vector<16x32xf32> to vector<16xf32>
    %171 = vector.shape_cast %170 : vector<16xf32> to vector<16x1xf32>
    %cst_68 = arith.constant 3.200000e+01 : f32
    %172 = vector.broadcast %cst_68 : f32 to vector<16x1xf32>
    %173 = arith.divf %171, %172 : vector<16x1xf32>
    %174 = vector.broadcast %164 : vector<16x1xf32> to vector<16x32xf32>
    %175 = arith.subf %156, %174 : vector<16x32xf32>
    %cst_69 = arith.constant 9.99999996E-13 : f32
    %176 = vector.broadcast %cst_69 : f32 to vector<16x1xf32>
    %177 = arith.addf %173, %176 : vector<16x1xf32>
    %178 = math.rsqrt %177 : vector<16x1xf32>
    %179 = vector.broadcast %178 : vector<16x1xf32> to vector<16x32xf32>
    %180 = arith.mulf %175, %179 : vector<16x32xf32>
    %181 = vector.broadcast %158 : vector<1x32xf32> to vector<16x32xf32>
    %182 = arith.mulf %180, %181 : vector<16x32xf32>
    %183 = vector.broadcast %160 : vector<1x32xf32> to vector<16x32xf32>
    %184 = arith.addf %182, %183 : vector<16x32xf32>
    %185 = arith.truncf %184 : vector<16x32xf32> to vector<16x32xbf16>
    %c1 = arith.constant 1 : index
    %c0_70 = arith.constant 0 : index
    %c0_71 = arith.constant 0 : index
    %186 = vector.load %arg5[%c1, %c0_70, %c0_71] : memref<2x32x96xbf16, #tpu.memory_space<vmem>>, vector<1x32x96xbf16>
    %187 = vector.shape_cast %186 : vector<1x32x96xbf16> to vector<32x96xbf16>
    %cst_72 = arith.constant dense<0.000000e+00> : vector<16x96xf32>
    %188 = tpu.matmul %185, %187, %cst_72 {dimension_numbers = #tpu.dot_dimension_numbers<[1], [0], [0], [1], [0, 0, 1, 1], [], []>} : vector<16x32xbf16>, vector<32x96xbf16>, vector<16x96xf32> -> vector<16x96xf32>
    %c1_73 = arith.constant 1 : index
    %c0_74 = arith.constant 0 : index
    %c0_75 = arith.constant 0 : index
    %189 = vector.load %arg6[%c1_73, %c0_74, %c0_75] : memref<2x1x96xf32, #tpu.memory_space<vmem>>, vector<1x1x96xf32>
    %190 = vector.shape_cast %189 : vector<1x1x96xf32> to vector<1x96xf32>
    %191 = vector.broadcast %190 : vector<1x96xf32> to vector<16x96xf32>
    %192 = arith.addf %188, %191 : vector<16x96xf32>
    %193 = vector.extract_strided_slice %192 {offsets = [0, 0], sizes = [16, 8], strides = [1, 1]} : vector<16x96xf32> to vector<16x8xf32>
    %194 = vector.shape_cast %193 : vector<16x8xf32> to vector<2x8x8xf32>
    %195 = vector.extract_strided_slice %192 {offsets = [0, 8], sizes = [16, 8], strides = [1, 1]} : vector<16x96xf32> to vector<16x8xf32>
    %196 = vector.shape_cast %195 : vector<16x8xf32> to vector<2x8x8xf32>
    %197 = vector.extract_strided_slice %192 {offsets = [0, 16], sizes = [16, 8], strides = [1, 1]} : vector<16x96xf32> to vector<16x8xf32>
    %198 = vector.shape_cast %197 : vector<16x8xf32> to vector<2x8x8xf32>
    %199 = vector.extract_strided_slice %192 {offsets = [0, 24], sizes = [16, 8], strides = [1, 1]} : vector<16x96xf32> to vector<16x8xf32>
    %200 = vector.shape_cast %199 : vector<16x8xf32> to vector<2x8x8xf32>
    %201 = vector.extract_strided_slice %192 {offsets = [0, 32], sizes = [16, 8], strides = [1, 1]} : vector<16x96xf32> to vector<16x8xf32>
    %202 = vector.shape_cast %201 : vector<16x8xf32> to vector<2x8x8xf32>
    %203 = vector.extract_strided_slice %192 {offsets = [0, 40], sizes = [16, 8], strides = [1, 1]} : vector<16x96xf32> to vector<16x8xf32>
    %204 = vector.shape_cast %203 : vector<16x8xf32> to vector<2x8x8xf32>
    %205 = vector.extract_strided_slice %192 {offsets = [0, 48], sizes = [16, 8], strides = [1, 1]} : vector<16x96xf32> to vector<16x8xf32>
    %206 = vector.shape_cast %205 : vector<16x8xf32> to vector<2x8x8xf32>
    %207 = vector.extract_strided_slice %192 {offsets = [0, 56], sizes = [16, 8], strides = [1, 1]} : vector<16x96xf32> to vector<16x8xf32>
    %208 = vector.shape_cast %207 : vector<16x8xf32> to vector<2x8x8xf32>
    %209 = vector.extract_strided_slice %192 {offsets = [0, 64], sizes = [16, 8], strides = [1, 1]} : vector<16x96xf32> to vector<16x8xf32>
    %210 = vector.shape_cast %209 : vector<16x8xf32> to vector<2x8x8xf32>
    %211 = vector.extract_strided_slice %192 {offsets = [0, 72], sizes = [16, 8], strides = [1, 1]} : vector<16x96xf32> to vector<16x8xf32>
    %212 = vector.shape_cast %211 : vector<16x8xf32> to vector<2x8x8xf32>
    %213 = vector.extract_strided_slice %192 {offsets = [0, 80], sizes = [16, 8], strides = [1, 1]} : vector<16x96xf32> to vector<16x8xf32>
    %214 = vector.shape_cast %213 : vector<16x8xf32> to vector<2x8x8xf32>
    %215 = vector.extract_strided_slice %192 {offsets = [0, 88], sizes = [16, 8], strides = [1, 1]} : vector<16x96xf32> to vector<16x8xf32>
    %216 = vector.shape_cast %215 : vector<16x8xf32> to vector<2x8x8xf32>
    %217 = tpu.concatenate %194, %196, %198, %200 in 0 : vector<2x8x8xf32>, vector<2x8x8xf32>, vector<2x8x8xf32>, vector<2x8x8xf32> -> vector<8x8x8xf32>
    %218 = arith.truncf %217 : vector<8x8x8xf32> to vector<8x8x8xbf16>
    %219 = tpu.concatenate %202, %204, %206, %208 in 0 : vector<2x8x8xf32>, vector<2x8x8xf32>, vector<2x8x8xf32>, vector<2x8x8xf32> -> vector<8x8x8xf32>
    %220 = arith.truncf %219 : vector<8x8x8xf32> to vector<8x8x8xbf16>
    %221 = tpu.concatenate %210, %212, %214, %216 in 0 : vector<2x8x8xf32>, vector<2x8x8xf32>, vector<2x8x8xf32>, vector<2x8x8xf32> -> vector<8x8x8xf32>
    %222 = arith.truncf %221 : vector<8x8x8xf32> to vector<8x8x8xbf16>
    %cst_76 = arith.constant dense<0.000000e+00> : vector<8x8x8xf32>
    %223 = tpu.matmul %218, %220, %cst_76 {dimension_numbers = #tpu.dot_dimension_numbers<[2], [2], [1], [1], [0, 0, 0, 1, 1, 1], [0], [0]>} : vector<8x8x8xbf16>, vector<8x8x8xbf16>, vector<8x8x8xf32> -> vector<8x8x8xf32>
    %224 = vector.broadcast %1 : vector<8x1x8xf32> to vector<8x8x8xf32>
    %225 = arith.addf %223, %224 : vector<8x8x8xf32>
    %cst_77 = arith.constant dense<0xFF800000> : vector<8x8xf32>
    %226 = vector.multi_reduction <maximumf>, %225, %cst_77 [2] : vector<8x8x8xf32> to vector<8x8xf32>
    %227 = vector.shape_cast %226 : vector<8x8xf32> to vector<8x8x1xf32>
    %228 = vector.broadcast %227 : vector<8x8x1xf32> to vector<8x8x8xf32>
    %229 = arith.subf %225, %228 : vector<8x8x8xf32>
    %230 = math.exp %229 : vector<8x8x8xf32>
    %cst_78 = arith.constant dense<0.000000e+00> : vector<8x8xf32>
    %231 = vector.multi_reduction <add>, %230, %cst_78 [2] : vector<8x8x8xf32> to vector<8x8xf32>
    %232 = vector.shape_cast %231 : vector<8x8xf32> to vector<8x8x1xf32>
    %233 = vector.broadcast %232 : vector<8x8x1xf32> to vector<8x8x8xf32>
    %234 = arith.divf %230, %233 : vector<8x8x8xf32>
    %235 = arith.truncf %234 : vector<8x8x8xf32> to vector<8x8x8xbf16>
    %cst_79 = arith.constant dense<0.000000e+00> : vector<8x8x8xf32>
    %236 = tpu.matmul %235, %222, %cst_79 {dimension_numbers = #tpu.dot_dimension_numbers<[2], [1], [1], [2], [0, 0, 0, 1, 1, 2], [0], [0]>} : vector<8x8x8xbf16>, vector<8x8x8xbf16>, vector<8x8x8xf32> -> vector<8x8x8xf32>
    %237 = vector.extract_strided_slice %236 {offsets = [0, 0, 0], sizes = [2, 8, 8], strides = [1, 1, 1]} : vector<8x8x8xf32> to vector<2x8x8xf32>
    %238 = vector.shape_cast %237 : vector<2x8x8xf32> to vector<16x8xf32>
    %239 = vector.extract_strided_slice %236 {offsets = [2, 0, 0], sizes = [2, 8, 8], strides = [1, 1, 1]} : vector<8x8x8xf32> to vector<2x8x8xf32>
    %240 = vector.shape_cast %239 : vector<2x8x8xf32> to vector<16x8xf32>
    %241 = vector.extract_strided_slice %236 {offsets = [4, 0, 0], sizes = [2, 8, 8], strides = [1, 1, 1]} : vector<8x8x8xf32> to vector<2x8x8xf32>
    %242 = vector.shape_cast %241 : vector<2x8x8xf32> to vector<16x8xf32>
    %243 = vector.extract_strided_slice %236 {offsets = [6, 0, 0], sizes = [2, 8, 8], strides = [1, 1, 1]} : vector<8x8x8xf32> to vector<2x8x8xf32>
    %244 = vector.shape_cast %243 : vector<2x8x8xf32> to vector<16x8xf32>
    %245 = tpu.concatenate %238, %240, %242, %244 in 1 : vector<16x8xf32>, vector<16x8xf32>, vector<16x8xf32>, vector<16x8xf32> -> vector<16x32xf32>
    %246 = arith.truncf %245 : vector<16x32xf32> to vector<16x32xbf16>
    %c1_80 = arith.constant 1 : index
    %c0_81 = arith.constant 0 : index
    %c0_82 = arith.constant 0 : index
    %247 = vector.load %arg7[%c1_80, %c0_81, %c0_82] : memref<2x32x32xbf16, #tpu.memory_space<vmem>>, vector<1x32x32xbf16>
    %248 = vector.shape_cast %247 : vector<1x32x32xbf16> to vector<32x32xbf16>
    %cst_83 = arith.constant dense<0.000000e+00> : vector<16x32xf32>
    %249 = tpu.matmul %246, %248, %cst_83 {dimension_numbers = #tpu.dot_dimension_numbers<[1], [0], [0], [1], [0, 0, 1, 1], [], []>} : vector<16x32xbf16>, vector<32x32xbf16>, vector<16x32xf32> -> vector<16x32xf32>
    %c1_84 = arith.constant 1 : index
    %c0_85 = arith.constant 0 : index
    %c0_86 = arith.constant 0 : index
    %250 = vector.load %arg8[%c1_84, %c0_85, %c0_86] : memref<2x1x32xf32, #tpu.memory_space<vmem>>, vector<1x1x32xf32>
    %251 = vector.shape_cast %250 : vector<1x1x32xf32> to vector<1x32xf32>
    %252 = vector.broadcast %251 : vector<1x32xf32> to vector<16x32xf32>
    %253 = arith.addf %249, %252 : vector<16x32xf32>
    %254 = arith.addf %253, %184 : vector<16x32xf32>
    %c1_87 = arith.constant 1 : index
    %c0_88 = arith.constant 0 : index
    %c0_89 = arith.constant 0 : index
    %255 = vector.load %arg9[%c1_87, %c0_88, %c0_89] : memref<2x1x32xf32, #tpu.memory_space<vmem>>, vector<1x1x32xf32>
    %256 = vector.shape_cast %255 : vector<1x1x32xf32> to vector<1x32xf32>
    %c1_90 = arith.constant 1 : index
    %c0_91 = arith.constant 0 : index
    %c0_92 = arith.constant 0 : index
    %257 = vector.load %arg10[%c1_90, %c0_91, %c0_92] : memref<2x1x32xf32, #tpu.memory_space<vmem>>, vector<1x1x32xf32>
    %258 = vector.shape_cast %257 : vector<1x1x32xf32> to vector<1x32xf32>
    %cst_93 = arith.constant dense<0.000000e+00> : vector<16xf32>
    %259 = vector.multi_reduction <add>, %254, %cst_93 [1] : vector<16x32xf32> to vector<16xf32>
    %260 = vector.shape_cast %259 : vector<16xf32> to vector<16x1xf32>
    %cst_94 = arith.constant 3.200000e+01 : f32
    %261 = vector.broadcast %cst_94 : f32 to vector<16x1xf32>
    %262 = arith.divf %260, %261 : vector<16x1xf32>
    %263 = vector.broadcast %262 : vector<16x1xf32> to vector<16x32xf32>
    %264 = arith.subf %254, %263 : vector<16x32xf32>
    %265 = vector.broadcast %262 : vector<16x1xf32> to vector<16x32xf32>
    %266 = arith.subf %254, %265 : vector<16x32xf32>
    %267 = arith.mulf %264, %266 : vector<16x32xf32>
    %cst_95 = arith.constant dense<0.000000e+00> : vector<16xf32>
    %268 = vector.multi_reduction <add>, %267, %cst_95 [1] : vector<16x32xf32> to vector<16xf32>
    %269 = vector.shape_cast %268 : vector<16xf32> to vector<16x1xf32>
    %cst_96 = arith.constant 3.200000e+01 : f32
    %270 = vector.broadcast %cst_96 : f32 to vector<16x1xf32>
    %271 = arith.divf %269, %270 : vector<16x1xf32>
    %272 = vector.broadcast %262 : vector<16x1xf32> to vector<16x32xf32>
    %273 = arith.subf %254, %272 : vector<16x32xf32>
    %cst_97 = arith.constant 9.99999996E-13 : f32
    %274 = vector.broadcast %cst_97 : f32 to vector<16x1xf32>
    %275 = arith.addf %271, %274 : vector<16x1xf32>
    %276 = math.rsqrt %275 : vector<16x1xf32>
    %277 = vector.broadcast %276 : vector<16x1xf32> to vector<16x32xf32>
    %278 = arith.mulf %273, %277 : vector<16x32xf32>
    %279 = vector.broadcast %256 : vector<1x32xf32> to vector<16x32xf32>
    %280 = arith.mulf %278, %279 : vector<16x32xf32>
    %281 = vector.broadcast %258 : vector<1x32xf32> to vector<16x32xf32>
    %282 = arith.addf %280, %281 : vector<16x32xf32>
    %283 = arith.truncf %282 : vector<16x32xf32> to vector<16x32xbf16>
    %c1_98 = arith.constant 1 : index
    %c0_99 = arith.constant 0 : index
    %c0_100 = arith.constant 0 : index
    %284 = vector.load %arg11[%c1_98, %c0_99, %c0_100] : memref<2x32x64xbf16, #tpu.memory_space<vmem>>, vector<1x32x64xbf16>
    %285 = vector.shape_cast %284 : vector<1x32x64xbf16> to vector<32x64xbf16>
    %cst_101 = arith.constant dense<0.000000e+00> : vector<16x64xf32>
    %286 = tpu.matmul %283, %285, %cst_101 {dimension_numbers = #tpu.dot_dimension_numbers<[1], [0], [0], [1], [0, 0, 1, 1], [], []>} : vector<16x32xbf16>, vector<32x64xbf16>, vector<16x64xf32> -> vector<16x64xf32>
    %c1_102 = arith.constant 1 : index
    %c0_103 = arith.constant 0 : index
    %c0_104 = arith.constant 0 : index
    %287 = vector.load %arg12[%c1_102, %c0_103, %c0_104] : memref<2x1x64xf32, #tpu.memory_space<vmem>>, vector<1x1x64xf32>
    %288 = vector.shape_cast %287 : vector<1x1x64xf32> to vector<1x64xf32>
    %289 = vector.broadcast %288 : vector<1x64xf32> to vector<16x64xf32>
    %290 = arith.addf %286, %289 : vector<16x64xf32>
    %cst_105 = arith.constant 5.000000e-01 : f32
    %291 = vector.broadcast %cst_105 : f32 to vector<16x64xf32>
    %292 = arith.mulf %291, %290 : vector<16x64xf32>
    %cst_106 = arith.constant 4.471500e-02 : f32
    %293 = vector.broadcast %cst_106 : f32 to vector<16x64xf32>
    %294 = arith.mulf %293, %290 : vector<16x64xf32>
    %295 = arith.mulf %294, %290 : vector<16x64xf32>
    %296 = arith.mulf %295, %290 : vector<16x64xf32>
    %297 = arith.addf %290, %296 : vector<16x64xf32>
    %cst_107 = arith.constant 0.797884583 : f32
    %298 = vector.broadcast %cst_107 : f32 to vector<16x64xf32>
    %299 = arith.mulf %298, %297 : vector<16x64xf32>
    %300 = math.tanh %299 : vector<16x64xf32>
    %cst_108 = arith.constant 1.000000e+00 : f32
    %301 = vector.broadcast %cst_108 : f32 to vector<16x64xf32>
    %302 = arith.addf %301, %300 : vector<16x64xf32>
    %303 = arith.mulf %292, %302 : vector<16x64xf32>
    %304 = arith.truncf %303 : vector<16x64xf32> to vector<16x64xbf16>
    %c1_109 = arith.constant 1 : index
    %c0_110 = arith.constant 0 : index
    %c0_111 = arith.constant 0 : index
    %305 = vector.load %arg13[%c1_109, %c0_110, %c0_111] : memref<2x64x32xbf16, #tpu.memory_space<vmem>>, vector<1x64x32xbf16>
    %306 = vector.shape_cast %305 : vector<1x64x32xbf16> to vector<64x32xbf16>
    %cst_112 = arith.constant dense<0.000000e+00> : vector<16x32xf32>
    %307 = tpu.matmul %304, %306, %cst_112 {dimension_numbers = #tpu.dot_dimension_numbers<[1], [0], [0], [1], [0, 0, 1, 1], [], []>} : vector<16x64xbf16>, vector<64x32xbf16>, vector<16x32xf32> -> vector<16x32xf32>
    %c1_113 = arith.constant 1 : index
    %c0_114 = arith.constant 0 : index
    %c0_115 = arith.constant 0 : index
    %308 = vector.load %arg14[%c1_113, %c0_114, %c0_115] : memref<2x1x32xf32, #tpu.memory_space<vmem>>, vector<1x1x32xf32>
    %309 = vector.shape_cast %308 : vector<1x1x32xf32> to vector<1x32xf32>
    %310 = vector.broadcast %309 : vector<1x32xf32> to vector<16x32xf32>
    %311 = arith.addf %307, %310 : vector<16x32xf32>
    %312 = arith.addf %311, %282 : vector<16x32xf32>
    %c1_116 = arith.constant 1 : index
    %c0_117 = arith.constant 0 : index
    %c0_118 = arith.constant 0 : index
    %313 = vector.load %arg15[%c1_116, %c0_117, %c0_118] : memref<2x1x32xf32, #tpu.memory_space<vmem>>, vector<1x1x32xf32>
    %314 = vector.shape_cast %313 : vector<1x1x32xf32> to vector<1x32xf32>
    %c1_119 = arith.constant 1 : index
    %c0_120 = arith.constant 0 : index
    %c0_121 = arith.constant 0 : index
    %315 = vector.load %arg16[%c1_119, %c0_120, %c0_121] : memref<2x1x32xf32, #tpu.memory_space<vmem>>, vector<1x1x32xf32>
    %316 = vector.shape_cast %315 : vector<1x1x32xf32> to vector<1x32xf32>
    %cst_122 = arith.constant dense<0.000000e+00> : vector<16xf32>
    %317 = vector.multi_reduction <add>, %312, %cst_122 [1] : vector<16x32xf32> to vector<16xf32>
    %318 = vector.shape_cast %317 : vector<16xf32> to vector<16x1xf32>
    %cst_123 = arith.constant 3.200000e+01 : f32
    %319 = vector.broadcast %cst_123 : f32 to vector<16x1xf32>
    %320 = arith.divf %318, %319 : vector<16x1xf32>
    %321 = vector.broadcast %320 : vector<16x1xf32> to vector<16x32xf32>
    %322 = arith.subf %312, %321 : vector<16x32xf32>
    %323 = vector.broadcast %320 : vector<16x1xf32> to vector<16x32xf32>
    %324 = arith.subf %312, %323 : vector<16x32xf32>
    %325 = arith.mulf %322, %324 : vector<16x32xf32>
    %cst_124 = arith.constant dense<0.000000e+00> : vector<16xf32>
    %326 = vector.multi_reduction <add>, %325, %cst_124 [1] : vector<16x32xf32> to vector<16xf32>
    %327 = vector.shape_cast %326 : vector<16xf32> to vector<16x1xf32>
    %cst_125 = arith.constant 3.200000e+01 : f32
    %328 = vector.broadcast %cst_125 : f32 to vector<16x1xf32>
    %329 = arith.divf %327, %328 : vector<16x1xf32>
    %330 = vector.broadcast %320 : vector<16x1xf32> to vector<16x32xf32>
    %331 = arith.subf %312, %330 : vector<16x32xf32>
    %cst_126 = arith.constant 9.99999996E-13 : f32
    %332 = vector.broadcast %cst_126 : f32 to vector<16x1xf32>
    %333 = arith.addf %329, %332 : vector<16x1xf32>
    %334 = math.rsqrt %333 : vector<16x1xf32>
    %335 = vector.broadcast %334 : vector<16x1xf32> to vector<16x32xf32>
    %336 = arith.mulf %331, %335 : vector<16x32xf32>
    %337 = vector.broadcast %314 : vector<1x32xf32> to vector<16x32xf32>
    %338 = arith.mulf %336, %337 : vector<16x32xf32>
    %339 = vector.broadcast %316 : vector<1x32xf32> to vector<16x32xf32>
    %340 = arith.addf %338, %339 : vector<16x32xf32>
    %341 = vector.shape_cast %340 : vector<16x32xf32> to vector<2x8x32xf32>
    %cst_127 = arith.constant dense<0.000000e+00> : vector<2x32xf32>
    %342 = vector.multi_reduction <add>, %341, %cst_127 [1] : vector<2x8x32xf32> to vector<2x32xf32>
    %cst_128 = arith.constant 8.000000e+00 : f32
    %343 = vector.broadcast %cst_128 : f32 to vector<2x32xf32>
    %344 = arith.divf %342, %343 : vector<2x32xf32>
    %345 = arith.truncf %344 : vector<2x32xf32> to vector<2x32xbf16>
    %c0_129 = arith.constant 0 : index
    %c0_130 = arith.constant 0 : index
    %346 = vector.load %arg17[%c0_129, %c0_130] : memref<32x4xbf16, #tpu.memory_space<vmem>>, vector<32x4xbf16>
    %cst_131 = arith.constant dense<0.000000e+00> : vector<2x4xf32>
    %347 = tpu.matmul %345, %346, %cst_131 {dimension_numbers = #tpu.dot_dimension_numbers<[1], [0], [0], [1], [0, 0, 1, 1], [], []>} : vector<2x32xbf16>, vector<32x4xbf16>, vector<2x4xf32> -> vector<2x4xf32>
    %c0_132 = arith.constant 0 : index
    %c0_133 = arith.constant 0 : index
    %348 = vector.load %arg18[%c0_132, %c0_133] : memref<1x4xf32, #tpu.memory_space<vmem>>, vector<1x4xf32>
    %349 = vector.broadcast %348 : vector<1x4xf32> to vector<2x4xf32>
    %350 = arith.addf %347, %349 : vector<2x4xf32>
    %c0_134 = arith.constant 0 : index
    %c0_135 = arith.constant 0 : index
    %351 = vector.load %arg19[%c0_134, %c0_135] : memref<2x4xf32, #tpu.memory_space<vmem>>, vector<2x4xf32>
    tpu.vector_store %arg19[%c0_134, %c0_135], %350 {strides = array<i32>} : memref<2x4xf32, #tpu.memory_space<vmem>>, vector<2x4xf32>,
    return
  }
  func.func @transform_0(%arg0: i32) -> (i32, i32) {
    %c0_i32 = arith.constant 0 : i32
    %c0_i32_0 = arith.constant 0 : i32
    %c0_i32_1 = arith.constant 0 : i32
    return %c0_i32, %c0_i32_0 : i32, i32
  }
  func.func @transform_1(%arg0: i32) -> (i32, i32, i32) {
    %c0_i32 = arith.constant 0 : i32
    %c0_i32_0 = arith.constant 0 : i32
    %c0_i32_1 = arith.constant 0 : i32
    %c0_i32_2 = arith.constant 0 : i32
    return %c0_i32, %c0_i32_0, %c0_i32_1 : i32, i32, i32
  }
  func.func @transform_2(%arg0: i32) -> (i32, i32) {
    %c0_i32 = arith.constant 0 : i32
    %c0_i32_0 = arith.constant 0 : i32
    %c0_i32_1 = arith.constant 0 : i32
    return %c0_i32, %c0_i32_0 : i32, i32
  }
  func.func @transform_3(%arg0: i32) -> (i32, i32) {
    %c0_i32 = arith.constant 0 : i32
    %c0_i32_0 = arith.constant 0 : i32
    %c0_i32_1 = arith.constant 0 : i32
    return %c0_i32, %c0_i32_0 : i32, i32
  }
  func.func @transform_4(%arg0: i32) -> (i32, i32, i32) {
    %c0_i32 = arith.constant 0 : i32
    %c0_i32_0 = arith.constant 0 : i32
    %c0_i32_1 = arith.constant 0 : i32
    %c0_i32_2 = arith.constant 0 : i32
    return %c0_i32, %c0_i32_0, %c0_i32_1 : i32, i32, i32
  }
  func.func @transform_5(%arg0: i32) -> (i32, i32, i32) {
    %c0_i32 = arith.constant 0 : i32
    %c0_i32_0 = arith.constant 0 : i32
    %c0_i32_1 = arith.constant 0 : i32
    %c0_i32_2 = arith.constant 0 : i32
    return %c0_i32, %c0_i32_0, %c0_i32_1 : i32, i32, i32
  }
  func.func @transform_6(%arg0: i32) -> (i32, i32, i32) {
    %c0_i32 = arith.constant 0 : i32
    %c0_i32_0 = arith.constant 0 : i32
    %c0_i32_1 = arith.constant 0 : i32
    %c0_i32_2 = arith.constant 0 : i32
    return %c0_i32, %c0_i32_0, %c0_i32_1 : i32, i32, i32
  }
  func.func @transform_7(%arg0: i32) -> (i32, i32, i32) {
    %c0_i32 = arith.constant 0 : i32
    %c0_i32_0 = arith.constant 0 : i32
    %c0_i32_1 = arith.constant 0 : i32
    %c0_i32_2 = arith.constant 0 : i32
    return %c0_i32, %c0_i32_0, %c0_i32_1 : i32, i32, i32
  }
  func.func @transform_8(%arg0: i32) -> (i32, i32, i32) {
    %c0_i32 = arith.constant 0 : i32
    %c0_i32_0 = arith.constant 0 : i32
    %c0_i32_1 = arith.constant 0 : i32
    %c0_i32_2 = arith.constant 0 : i32
    return %c0_i32, %c0_i32_0, %c0_i32_1 : i32, i32, i32
  }
  func.func @transform_9(%arg0: i32) -> (i32, i32, i32) {
    %c0_i32 = arith.constant 0 : i32
    %c0_i32_0 = arith.constant 0 : i32
    %c0_i32_1 = arith.constant 0 : i32
    %c0_i32_2 = arith.constant 0 : i32
    return %c0_i32, %c0_i32_0, %c0_i32_1 : i32, i32, i32
  }
  func.func @transform_10(%arg0: i32) -> (i32, i32, i32) {
    %c0_i32 = arith.constant 0 : i32
    %c0_i32_0 = arith.constant 0 : i32
    %c0_i32_1 = arith.constant 0 : i32
    %c0_i32_2 = arith.constant 0 : i32
    return %c0_i32, %c0_i32_0, %c0_i32_1 : i32, i32, i32
  }
  func.func @transform_11(%arg0: i32) -> (i32, i32, i32) {
    %c0_i32 = arith.constant 0 : i32
    %c0_i32_0 = arith.constant 0 : i32
    %c0_i32_1 = arith.constant 0 : i32
    %c0_i32_2 = arith.constant 0 : i32
    return %c0_i32, %c0_i32_0, %c0_i32_1 : i32, i32, i32
  }
  func.func @transform_12(%arg0: i32) -> (i32, i32, i32) {
    %c0_i32 = arith.constant 0 : i32
    %c0_i32_0 = arith.constant 0 : i32
    %c0_i32_1 = arith.constant 0 : i32
    %c0_i32_2 = arith.constant 0 : i32
    return %c0_i32, %c0_i32_0, %c0_i32_1 : i32, i32, i32
  }
  func.func @transform_13(%arg0: i32) -> (i32, i32, i32) {
    %c0_i32 = arith.constant 0 : i32
    %c0_i32_0 = arith.constant 0 : i32
    %c0_i32_1 = arith.constant 0 : i32
    %c0_i32_2 = arith.constant 0 : i32
    return %c0_i32, %c0_i32_0, %c0_i32_1 : i32, i32, i32
  }
  func.func @transform_14(%arg0: i32) -> (i32, i32, i32) {
    %c0_i32 = arith.constant 0 : i32
    %c0_i32_0 = arith.constant 0 : i32
    %c0_i32_1 = arith.constant 0 : i32
    %c0_i32_2 = arith.constant 0 : i32
    return %c0_i32, %c0_i32_0, %c0_i32_1 : i32, i32, i32
  }
  func.func @transform_15(%arg0: i32) -> (i32, i32, i32) {
    %c0_i32 = arith.constant 0 : i32
    %c0_i32_0 = arith.constant 0 : i32
    %c0_i32_1 = arith.constant 0 : i32
    %c0_i32_2 = arith.constant 0 : i32
    return %c0_i32, %c0_i32_0, %c0_i32_1 : i32, i32, i32
  }
  func.func @transform_16(%arg0: i32) -> (i32, i32) {
    %c0_i32 = arith.constant 0 : i32
    %c0_i32_0 = arith.constant 0 : i32
    %c0_i32_1 = arith.constant 0 : i32
    return %c0_i32, %c0_i32_0 : i32, i32
  }
  func.func @transform_17(%arg0: i32) -> (i32, i32) {
    %c0_i32 = arith.constant 0 : i32
    %c0_i32_0 = arith.constant 0 : i32
    %c0_i32_1 = arith.constant 0 : i32
    return %c0_i32, %c0_i32_0 : i32, i32
  }
  func.func @transform_18(%arg0: i32) -> (i32, i32) {
    %c0_i32 = arith.constant 0 : i32
    %c0_i32_0 = arith.constant 0 : i32
    %c0_i32_1 = arith.constant 0 : i32
    return %c0_i32, %c0_i32_0 : i32, i32
  }
}

</mosaic_0001>

<bundles_post_ra>
// kernel: tpu_custom_call.1
= control target key start
LH: loop header
LB: loop body
LE: loop exit
PB: predicated region body
PF: predicated region fallthrough
CT: control target
= control target key end

     0   :  { %s4389_s0 = inlined_call_operand.vmem [shape: f32[16,32], index: 0, kind: input, shape index: {}]   ;;  %s4390_s1 = inlined_call_operand.vmem [shape: f32[2,1,8], index: 1, kind: input, shape index: {}]   ;;  %s4391_s2 = inlined_call_operand.vmem [shape: f32[1,32], index: 2, kind: input, shape index: {}]   ;;  %s4392_s3 = inlined_call_operand.hbm [shape: f32[1,32], index: 3, kind: input, shape index: {}]   ;;  %s4393_s4 = inlined_call_operand.vmem [shape: bf16[2,32,96], index: 4, kind: input, shape index: {}]   ;;  %s4394_s5 = inlined_call_operand.vmem [shape: f32[2,1,96], index: 5, kind: input, shape index: {}]   ;;  %s4395_s6 = inlined_call_operand.vmem [shape: bf16[2,32,32], index: 6, kind: input, shape index: {}]   ;;  %s4396_s7 = inlined_call_operand.vmem [shape: f32[2,1,32], index: 7, kind: input, shape index: {}]   ;;  %s4397_s8 = inlined_call_operand.vmem [shape: f32[2,1,32], index: 8, kind: input, shape index: {}]   ;;  %s4398_s9 = inlined_call_operand.vmem [shape: f32[2,1,32], index: 9, kind: input, shape index: {}]   ;;  %s4399_s10 = inlined_call_operand.vmem [shape: bf16[2,32,64], index: 10, kind: input, shape index: {}]   ;;  %s4400_s11 = inlined_call_operand.vmem [shape: f32[2,1,64], index: 11, kind: input, shape index: {}]   ;;  %s4401_s12 = inlined_call_operand.vmem [shape: bf16[2,64,32], index: 12, kind: input, shape index: {}]   ;;  %s4402_s13 = inlined_call_operand.vmem [shape: f32[2,1,32], index: 13, kind: input, shape index: {}]   ;;  %s4403_s14 = inlined_call_operand.vmem [shape: f32[2,1,32], index: 14, kind: input, shape index: {}]   ;;  %s4404_s15 = inlined_call_operand.vmem [shape: f32[2,1,32], index: 15, kind: input, shape index: {}]   ;;  %s4405_s16 = inlined_call_operand.vmem [shape: bf16[32,4], index: 16, kind: input, shape index: {}]   ;;  %s4406_s17 = inlined_call_operand.vmem [shape: f32[1,4], index: 17, kind: input, shape index: {}]   ;;  %s4407_s18 = inlined_call_operand.hbm [shape: f32[2,4], index: 18, kind: output, shape index: {}]  }
   0x1   :  { %4411 = sst [smem:[#allocation8_spill]] %s4389_s0 }
   0x2   :  { %4412 = sst [smem:[#allocation9_spill]] %s4390_s1 }
   0x3   :  { %4413 = sst [smem:[#allocation10_spill]] %s4391_s2 }
   0x4   :  { %23 = vsyncpa [#allocation3], 0 }
   0x5   :  { %24 = vsyncpa [#allocation4], 0  ;;  %s3632_s27 = smov [#allocation2]   ;;  %s3584_s0 = scalar_lea.hbm %s4392_s3, 16 }
   0x6   :  { %s37_s28 = sshll.u32 %s3632_s27, 4  ;;  %p3585_p0 = scmp.ne.s32.totalorder %s4392_s3, %s3584_s0  ;;  %s38_s28 = int_to_ptr.vmem [resolvable:$true] %s37_s28 }
   0x7   :  { %p3588_p1 = scmp.lt.u32.totalorder %s3584_s0, %s4392_s3 }
   0x9   :  { %p3590_p2 = pnand %p3588_p1, %p3585_p0 }
   0xb   :  { %3593 = shalt.err (!%p3590_p2)
}
   0xc   :  { %s3594_s22 = scalar_lea.vmem %s38_s28, 16  ;;  %s3598_s2 = scalar_lea.vmem %s38_s28, 32 }
   0xd   :  { %p3595_p3 = scmp.ne.s32.totalorder %s38_s28, %s3594_s22  ;;  %p3599_p4 = scmp.lt.s32.totalorder %s38_s28, %s38_s28 }
   0xe   :  { %p3600_p5 = scmp.lt.s32.totalorder %s3598_s2, %s3594_s22 }
  0x10   :  { %p3601_p6 = por %p3600_p5, %p3599_p4 }
  0x12   :  { %p3602_p7 = pnand %p3601_p6, %p3595_p3 }
  0x14   :  { %3605 = shalt.err (!%p3602_p7)
}
  0x15   :  { %40 = dma.hbm_to_vmem [thread:$0]  %s4392_s3, 16, %s38_s28, [#allocation3]  }
  0x16   :  { %3628 = dma.done.wait [#allocation3], 16  }
  0x17   :  { %3629 = vsyncadd [#allocation3], 4294967280  ;;  %vm79_vm0 = vcmask 261120   ;;  %s4414_s27 = sld [smem:[#allocation8_spill]]  ;;  %v3468_v14 = vld [vmem:[%s4393_s4] sm:$0xff]   ;;  %v3633_v15 = vmov 0.0  }
  0x18   :  { %3124 = vmatprep.subr.bf16.mxu0 %v3633_v15  ;;  %3132 = vmatprep.subr.bf16.mxu1 %v3633_v15  ;;  %v3469_v16 = vld [vmem:[%s4393_s4 + $0x8] sm:$0xff]   ;;  %vm3634_vm1 = vmmov 0   ;;  %s4415_s21 = sld [smem:[#allocation10_spill]]  ;;  %v2918_v29 = vld [vmem:[#allocation2] ss:$0 sm:$0xff]  ;;  %s3635_s23 = smov 112  }
  0x19   :  { %3125 = vmatpush3.bf16.msra.mxu0 %v3468_v14  ;;  %3128 = vmatprep.mubr.msk.bf16.mxu0 %vm3634_vm1, %v3633_v15  ;;  %v2919_v34 = vld [vmem:[%s4394_s5] ss:$0 sm:$0xff]  ;;  %s3636_s24 = smov 120   ;;  %s3637_s25 = smov 104   ;;  %vm234_vm2 = vcmask 64512   ;;  %vm725_vm3 = vcmask 1043456  }
  0x1a   :  { %3126 = vmatprep.subr.bf16.mxu0 %v3633_v15  ;;  %3134 = vmatprep.mubr.msk.bf16.mxu1 %vm3634_vm1, %v3633_v15  ;;  %s3638_s26 = smov 96   ;;  %s4416_s3 = sld [smem:[#allocation9_spill]]  ;;  %vm1131_vm4 = vcmask 130048   ;;  %vm1134_vm5 = vcmask 195584   ;;  %vm1377_vm6 = vcmask 523264   ;;  %vm2842_vm7 = vcmask 1041409  }
  0x1b   :  { %s3640_s19 = smov 8   ;;  %s3641_s2 = smov 16   ;;  %vm2900_vm8 = vcmask 25600  }
  0x1c   :  { %s4410_s29 = smov 24   ;;  %s3643_s28 = smov [#allocation5]  }
  0x1d   :  { %v75_v0 = vld [vmem:[%s4414_s27] sm:$0xff]  ;;  %v76_v1 = vld [vmem:[%s4414_s27 + $0x8] sm:$0xff]  ;;  %3127 = vmatpush3.bf16.msra.mxu0 %v3469_v16  ;;  %s3639_s27 = smov 64   ;;  %s2908_s0 = sshll.u32 %s3643_s28, 4  ;;  %s2909_s0 = int_to_ptr.vmem [resolvable:$true] %s2908_s0 }
  0x1e   :  { %v80_v2 = vsel %vm79_vm0, %v75_v0, 0.0  ;;  %v83_v3 = vsel %vm79_vm0, %v76_v1, 0.0  ;;  %3138 = vmatprep.subr.bf16.mxu0 %v3633_v15  ;;  %v2917_v25 = vld [vmem:[%s4415_s21] ss:$0 sm:$0xff]  ;;  %s3606_s1 = scalar_lea.vmem %s2909_s0, 32  ;;  %p3611_p9 = scmp.lt.s32.totalorder %s2909_s0, %s2909_s0 }
  0x1f   :  { %81 = vadd.xlane.f32.xlu0 %v80_v2  ;;  %p3607_p8 = scmp.ne.s32.totalorder %s2909_s0, %s3606_s1  ;;  %p3612_p10 = scmp.lt.s32.totalorder %s3606_s1, %s3606_s1 }
  0x21   :  { %p3613_p11 = por %p3612_p10, %p3611_p9 }
  0x23   :  { %84 = vadd.xlane.f32.xlu0 %v83_v3  ;;  %p3614_p12 = pnand %p3613_p11, %p3607_p8 }
  0xac   :  { %v82_v4 = vpop.xlane.xlu0 %81 }
  0xad   :  { %v87_v5 = vmul.f32 0.03125, %v82_v4 }
  0xaf   :  { %v89_v6 = vsub.f32 %v75_v0, %v87_v5 }
  0xb0   :  { %v85_v7 = vpop.xlane.xlu0 %84 }
  0xb1   :  { %v88_v8 = vmul.f32 0.03125, %v85_v7  ;;  %v91_v9 = vmul.f32 %v89_v6, %v89_v6 }
  0xb3   :  { %v90_v10 = vsub.f32 %v76_v1, %v88_v8  ;;  %v93_v11 = vsel %vm79_vm0, %v91_v9, 0.0 }
  0xb4   :  { %94 = vadd.xlane.f32.xlu1 %v93_v11 }
  0xb5   :  { %v92_v12 = vmul.f32 %v90_v10, %v90_v10 }
  0xb7   :  { %v96_v13 = vsel %vm79_vm0, %v92_v12, 0.0 }
  0xb8   :  { %97 = vadd.xlane.f32.xlu1 %v96_v13  ;;  %v3875_v13 = vld [vmem:[%s4416_s3 + $0x1] ss:$0 sm:$0xff] }
 0x141   :  { %v95_v17 = vpop.xlane.xlu1 %94 }
 0x142   :  { %v99_v18 = vmul.f32 0.03125, %v95_v17 }
 0x144   :  { %v101_v19 = vadd.f32 1e-12, %v99_v18  ;;  %v2923_v18 = vld [vmem:[%s4416_s3] ss:$0 sm:$0xff] }
 0x145   :  { %v98_v20 = vpop.xlane.xlu1 %97 }
 0x146   :  { %3490 = vrsqrt.f32 %v101_v19  ;;  %v100_v21 = vmul.f32 0.03125, %v98_v20 }
 0x148   :  { %v102_v22 = vadd.f32 1e-12, %v100_v21 }
 0x14a   :  { %3492 = vrsqrt.f32 %v102_v22 }
 0x150   :  { %v3491_v23 = vpop.eup %3490 }
 0x151   :  { %v105_v24 = vmul.f32 %v3491_v23, %v89_v6 }
 0x153   :  { %v113_v28 = vmul.f32 %v2917_v25, %v105_v24 }
 0x154   :  { %v3493_v26 = vpop.eup %3492 }
 0x155   :  { %v106_v27 = vmul.f32 %v3493_v26, %v90_v10  ;;  %v3778_v31 = vadd.f32 %v2918_v29, %v113_v28 }
 0x157   :  { %v114_v30 = vmul.f32 %v2917_v25, %v106_v27 }
 0x159   :  { %v3780_v32 = vadd.f32 %v2918_v29, %v114_v30 }
 0x15b   :  { %v123_v33 = vpack.c.bf16 %v3780_v32, %v3778_v31 }
 0x15d   :  { %3129 = vmatmul.mubr.msk.bf16.vlgmr.msra.gmra.mrb[0].mxu0 %vm79_vm0, %v123_v33 }
 0x15e   :  { %3140 = vmatprep.mubr.msk.bf16.mxu0 %vm3634_vm1, %v3633_v15 }
 0x230   :  { %v184_v35 = vpop.f32.mrb[0].mxu0 }
 0x231   :  { %v3130_v36 = vpop.f32.mrb[1].mxu0  ;;  %v185_v38 = vadd.f32 %v2919_v34, %v184_v35 }
 0x232   :  { %v187_v37 = vpop.f32.mrb[2].mxu0 }
 0x233   :  { %v188_v39 = vadd.f32 %v2919_v34, %v187_v37  ;;  %v3131_v40 = vpop.f32.mrb[3].mxu0  ;;  %v211_v43 = vpack.c.bf16 %v185_v38, %v185_v38 }
 0x235   :  { %v3413_v41 = vpack.i.bf16 %v188_v39, %v185_v38  ;;  %v3792_v42 = vpack.c.bf16 %v188_v39, %v188_v39 }
 0x237   :  { %3414 = vrot.lane.b32.xlu1 %v3413_v41, %s3635_s23  ;;  %3409 = vrot.lane.b32.xlu0 %v3413_v41, %s3636_s24 }
 0x23b   :  { %3419 = vrot.lane.b32.xlu1 %v3413_v41, %s3637_s25  ;;  %282 = vrot.lane.b32.xlu0 %v3792_v42, %s3638_s26 }
 0x23f   :  { %232 = vrot.lane.b32.xlu1 %v211_v43, %s3638_s26 }
 0x2a9   :  { %v3415_v44 = vpop.permute.xlu1 %3414  ;;  %v3410_v45 = vpop.permute.xlu0 %3409 }
 0x2aa   :  { %v3412_v46 = vunpack.i.h.bf16 %v3410_v45  ;;  %v3411_v47 = vunpack.i.l.bf16 %v3410_v45  ;;  %v3417_v48 = vunpack.i.h.bf16 %v3415_v44  ;;  %v3416_v49 = vunpack.i.l.bf16 %v3415_v44 }
 0x2ac   :  { %v3798_v50 = vpack.c.bf16 %v3412_v46, %v3412_v46  ;;  %v3800_v51 = vpack.c.bf16 %v3411_v47, %v3411_v47  ;;  %v3807_v55 = vpack.c.bf16 %v3417_v48, %v3417_v48  ;;  %v3809_v56 = vpack.c.bf16 %v3416_v49, %v3416_v49 }
 0x2ad   :  { %v3420_v52 = vpop.permute.xlu1 %3419  ;;  %v283_v53 = vpop.permute.xlu0 %282 }
 0x2ae   :  { %v288_v54 = vsel %vm234_vm2, %v283_v53, 0  ;;  %331 = vrot.lane.b32.xlu1 %v3800_v51, %s3638_s26  ;;  %380 = vrot.lane.b32.xlu0 %v3798_v50, %s3638_s26  ;;  %v3422_v57 = vunpack.i.h.bf16 %v3420_v52  ;;  %v3421_v58 = vunpack.i.l.bf16 %v3420_v52 }
 0x2af   :  { %3139 = vmatpush3.bf16.xpose.msra.mxu0 %v288_v54 }
 0x2b0   :  { %3150 = vmatprep.subr.bf16.mxu0 %v3633_v15  ;;  %v3817_v61 = vpack.c.bf16 %v3422_v57, %v3422_v57  ;;  %v3819_v62 = vpack.c.bf16 %v3421_v58, %v3421_v58 }
 0x2b1   :  { %v233_v59 = vpop.permute.xlu1 %232 }
 0x2b2   :  { %429 = vrot.lane.b32.xlu1 %v3809_v56, %s3638_s26  ;;  %478 = vrot.lane.b32.xlu0 %v3807_v55, %s3638_s26  ;;  %v239_v60 = vsel %vm234_vm2, %v233_v59, 0 }
 0x2b3   :  { %3133 = vmatpush3.bf16.xpose.msra.mxu1 %v239_v60 }
 0x2b4   :  { %3144 = vmatprep.subr.bf16.mxu1 %v3633_v15 }
 0x2b6   :  { %527 = vrot.lane.b32.xlu1 %v3819_v62, %s3638_s26  ;;  %576 = vrot.lane.b32.xlu0 %v3817_v61, %s3638_s26 }
 0x2b7   :  { %3141 = vmatmul.mubr.msk.bf16.vlgmr.msra.gmra.mrb[4].mxu0 %vm234_vm2, %v3792_v42 }
 0x2b8   :  { %3152 = vmatprep.mubr.msk.bf16.mxu0 %vm3634_vm1, %v3633_v15 }
 0x2ba   :  { %3135 = vmatmul.mubr.msk.bf16.vlgmr.msra.gmra.mrb[0].mxu1 %vm234_vm2, %v211_v43  ;;  %720 = vrot.lane.b32.xlu1 %v211_v43, %s3639_s27 }
 0x2bb   :  { %3146 = vmatprep.mubr.msk.bf16.mxu1 %vm3634_vm1, %v3633_v15 }
 0x320   :  { %v332_v63 = vpop.permute.xlu1 %331  ;;  %v381_v0 = vpop.permute.xlu0 %380 }
 0x321   :  { %v337_v1 = vsel %vm234_vm2, %v332_v63, 0  ;;  %v386_v2 = vsel %vm234_vm2, %v381_v0, 0 }
 0x322   :  { %3145 = vmatpush3.bf16.xpose.msra.mxu1 %v337_v1  ;;  %3151 = vmatpush3.bf16.xpose.msra.mxu0 %v386_v2 }
 0x323   :  { %3156 = vmatprep.subr.bf16.mxu1 %v3633_v15  ;;  %3162 = vmatprep.subr.bf16.mxu0 %v3633_v15 }
 0x324   :  { %v430_v3 = vpop.permute.xlu1 %429  ;;  %v479_v4 = vpop.permute.xlu0 %478 }
 0x325   :  { %v435_v5 = vsel %vm234_vm2, %v430_v3, 0  ;;  %v484_v6 = vsel %vm234_vm2, %v479_v4, 0 }
 0x328   :  { %v528_v7 = vpop.permute.xlu1 %527  ;;  %v577_v8 = vpop.permute.xlu0 %576 }
 0x329   :  { %3147 = vmatmul.mubr.msk.bf16.vlgmr.msra.gmra.mrb[4].mxu1 %vm234_vm2, %v3800_v51  ;;  %3153 = vmatmul.mubr.msk.bf16.vlgmr.msra.gmra.mrb[8].mxu0 %vm234_vm2, %v3798_v50  ;;  %v533_v9 = vsel %vm234_vm2, %v528_v7, 0  ;;  %v582_v10 = vsel %vm234_vm2, %v577_v8, 0 }
 0x32a   :  { %3157 = vmatpush3.bf16.xpose.msra.mxu1 %v435_v5  ;;  %3163 = vmatpush3.bf16.xpose.msra.mxu0 %v484_v6 }
 0x32b   :  { %3158 = vmatprep.mubr.msk.bf16.mxu1 %vm3634_vm1, %v3633_v15  ;;  %3164 = vmatprep.mubr.msk.bf16.mxu0 %vm3634_vm1, %v3633_v15 }
 0x32c   :  { %3168 = vmatprep.subr.bf16.mxu1 %v3633_v15  ;;  %3174 = vmatprep.subr.bf16.mxu0 %v3633_v15  ;;  %v721_v11 = vpop.permute.xlu1 %720 }
 0x32d   :  { %v727_v12 = vsel %vm725_vm3, %v721_v11, 0 }
 0x331   :  { %3159 = vmatmul.mubr.msk.bf16.vlgmr.msra.gmra.mrb[8].mxu1 %vm234_vm2, %v3809_v56  ;;  %3165 = vmatmul.mubr.msk.bf16.vlgmr.msra.gmra.mrb[12].mxu0 %vm234_vm2, %v3807_v55 }
 0x332   :  { %3169 = vmatpush3.bf16.xpose.msra.mxu1 %v533_v9  ;;  %3175 = vmatpush3.bf16.xpose.msra.mxu0 %v582_v10 }
 0x333   :  { %3170 = vmatprep.mubr.msk.bf16.mxu1 %vm3634_vm1, %v3633_v15  ;;  %3176 = vmatprep.mubr.msk.bf16.mxu0 %vm3634_vm1, %v3633_v15 }
 0x334   :  { %3180 = vmatprep.subr.bf16.mxu1 %v3633_v15  ;;  %3186 = vmatprep.subr.bf16.mxu0 %v3633_v15 }
 0x339   :  { %3171 = vmatmul.mubr.msk.bf16.vlgmr.msra.gmra.mrb[12].mxu1 %vm234_vm2, %v3819_v62  ;;  %3177 = vmatmul.mubr.msk.bf16.vlgmr.msra.gmra.mrb[16].mxu0 %vm234_vm2, %v3817_v61 }
 0x33a   :  { %3181 = vmatpush3.bf16.msra.mxu1 %v727_v12  ;;  %3188 = vmatprep.mubr.msk.bf16.mxu0 %vm3634_vm1, %v3633_v15 }
 0x33b   :  { %3182 = vmatprep.mubr.msk.bf16.mxu1 %vm3634_vm1, %v3633_v15  ;;  %3192 = vmatprep.subr.bf16.mxu1 %v3633_v15 }
 0x38a   :  { %v324_v14 = vpop.f32.mrb[4].mxu0 }
 0x38b   :  { %v325_v16 = vadd.f32 %v3875_v13, %v324_v14  ;;  %v3142_v17 = vpop.f32.mrb[5].mxu0 }
 0x38c   :  { %v327_v19 = vpop.f32.mrb[6].mxu0 }
 0x38d   :  { %v3143_v20 = vpop.f32.mrb[7].mxu0  ;;  %v275_v21 = vpop.f32.mrb[0].mxu1  ;;  %v627_v22 = vsel %vm234_vm2, %v325_v16, -inf }
 0x38e   :  { %v276_v23 = vadd.f32 %v2923_v18, %v275_v21  ;;  %628 = vmax.xlane.f32.xlu0 %v627_v22  ;;  %v3136_v24 = vpop.f32.mrb[1].mxu1 }
 0x38f   :  { %v278_v25 = vpop.f32.mrb[2].mxu1 }
 0x390   :  { %v3137_v26 = vpop.f32.mrb[3].mxu1  ;;  %v624_v27 = vsel %vm234_vm2, %v276_v23, -inf }
 0x391   :  { %625 = vmax.xlane.f32.xlu1 %v624_v27 }
 0x3fc   :  { %v373_v28 = vpop.f32.mrb[4].mxu1  ;;  %v422_v29 = vpop.f32.mrb[8].mxu0 }
 0x3fd   :  { %v374_v30 = vadd.f32 %v2923_v18, %v373_v28  ;;  %v3148_v33 = vpop.f32.mrb[5].mxu1  ;;  %v3154_v34 = vpop.f32.mrb[9].mxu0  ;;  %v423_v37 = vadd.f32 %v3875_v13, %v422_v29 }
 0x3fe   :  { %v376_v35 = vpop.f32.mrb[6].mxu1  ;;  %v425_v36 = vpop.f32.mrb[10].mxu0 }
 0x3ff   :  { %v3149_v38 = vpop.f32.mrb[7].mxu1  ;;  %v3155_v39 = vpop.f32.mrb[11].mxu0  ;;  %v630_v40 = vsel %vm234_vm2, %v374_v30, -inf  ;;  %v633_v41 = vsel %vm234_vm2, %v423_v37, -inf }
 0x400   :  { %631 = vmax.xlane.f32.xlu0 %v630_v40 }
 0x404   :  { %v471_v43 = vpop.f32.mrb[8].mxu1  ;;  %v520_v44 = vpop.f32.mrb[12].mxu0  ;;  %634 = vmax.xlane.f32.xlu0 %v633_v41 }
 0x405   :  { %v472_v45 = vadd.f32 %v2923_v18, %v471_v43  ;;  %v3887_v46 = vadd.f32 %v3875_v13, %v520_v44  ;;  %v3160_v47 = vpop.f32.mrb[9].mxu1  ;;  %v3166_v48 = vpop.f32.mrb[13].mxu0 }
 0x406   :  { %v474_v49 = vpop.f32.mrb[10].mxu1  ;;  %v523_v52 = vpop.f32.mrb[14].mxu0 }
 0x407   :  { %v3161_v53 = vpop.f32.mrb[11].mxu1  ;;  %v3167_v54 = vpop.f32.mrb[15].mxu0  ;;  %v639_v57 = vsel %vm234_vm2, %v3887_v46, -inf  ;;  %v636_v58 = vsel %vm234_vm2, %v472_v45, -inf }
 0x408   :  { %640 = vmax.xlane.f32.xlu0 %v639_v57  ;;  %637 = vmax.xlane.f32.xlu1 %v636_v58 }
 0x40c   :  { %v569_v59 = vpop.f32.mrb[12].mxu1  ;;  %v618_v60 = vpop.f32.mrb[16].mxu0 }
 0x40d   :  { %v570_v63 = vadd.f32 %v2923_v18, %v569_v59  ;;  %v3893_v0 = vadd.f32 %v3875_v13, %v618_v60  ;;  %v3172_v1 = vpop.f32.mrb[13].mxu1  ;;  %v3178_v2 = vpop.f32.mrb[17].mxu0 }
 0x40e   :  { %v572_v3 = vpop.f32.mrb[14].mxu1  ;;  %v621_v4 = vpop.f32.mrb[18].mxu0 }
 0x40f   :  { %v3173_v5 = vpop.f32.mrb[15].mxu1  ;;  %v3179_v6 = vpop.f32.mrb[19].mxu0  ;;  %v645_v7 = vsel %vm234_vm2, %v3893_v0, -inf  ;;  %v642_v8 = vsel %vm234_vm2, %v570_v63, -inf }
 0x410   :  { %646 = vmax.xlane.f32.xlu0 %v645_v7  ;;  %643 = vmax.xlane.f32.xlu1 %v642_v8 }
 0x41b   :  { %v629_v9 = vpop.xlane.xlu0 %628 }
 0x41c   :  { %v649_v10 = vsub.f32 %v325_v16, %v629_v9 }
 0x41e   :  { %v626_v11 = vpop.xlane.xlu1 %625  ;;  %v658_v12 = vmul.f32 1.442695, %v649_v10 }
 0x41f   :  { %v648_v14 = vsub.f32 %v276_v23, %v626_v11 }
 0x420   :  { %3494 = vpow2.f32 %v658_v12 }
 0x421   :  { %817 = vrot.lane.b32.xlu1 %v3800_v51, %s3639_s27  ;;  %v656_v17 = vmul.f32 1.442695, %v648_v14 }
 0x423   :  { %3496 = vpow2.f32 %v656_v17 }
 0x425   :  { %865 = vrot.lane.b32.xlu1 %v3798_v50, %s3639_s27 }
 0x426   :  { %769 = vrot.lane.b32.xlu0 %v3792_v42, %s3639_s27 }
 0x42a   :  { %v3495_v18 = vpop.eup %3494 }
 0x42b   :  { %v675_v19 = vsel %vm234_vm2, %v3495_v18, 0.0 }
 0x42d   :  { %v3905_v20 = vpop.eup %3496 }
 0x42e   :  { %v672_v50 = vsel %vm234_vm2, %v3905_v20, 0.0 }
 0x445   :  { %676 = vadd.xlane.f32.xlu0 %v675_v19 }
 0x449   :  { %673 = vadd.xlane.f32.xlu1 %v672_v50 }
 0x45a   :  { %913 = vrot.lane.b32.xlu1 %v3809_v56, %s3639_s27 }
 0x48d   :  { %v632_v42 = vpop.xlane.xlu0 %631 }
 0x48e   :  { %v650_v51 = vsub.f32 %v374_v30, %v632_v42 }
 0x490   :  { %v660_v16 = vmul.f32 1.442695, %v650_v51 }
 0x491   :  { %v635_v21 = vpop.xlane.xlu0 %634 }
 0x492   :  { %3498 = vpow2.f32 %v660_v16  ;;  %v651_v22 = vsub.f32 %v423_v37, %v635_v21 }
 0x494   :  { %v662_v23 = vmul.f32 1.442695, %v651_v22 }
 0x495   :  { %v638_v24 = vpop.xlane.xlu1 %637  ;;  %v641_v27 = vpop.xlane.xlu0 %640 }
 0x496   :  { %3500 = vpow2.f32 %v662_v23  ;;  %v652_v25 = vsub.f32 %v472_v45, %v638_v24  ;;  %v653_v44 = vsub.f32 %v3887_v46, %v641_v27 }
 0x498   :  { %v664_v26 = vmul.f32 1.442695, %v652_v25  ;;  %v666_v45 = vmul.f32 1.442695, %v653_v44 }
 0x49a   :  { %3502 = vpow2.f32 %v664_v26 }
 0x49c   :  { %v3911_v28 = vpop.eup %3498 }
 0x49d   :  { %v647_v29 = vpop.xlane.xlu0 %646  ;;  %v644_v33 = vpop.xlane.xlu1 %643  ;;  %v678_v56 = vsel %vm234_vm2, %v3911_v28, 0.0 }
 0x49e   :  { %v654_v34 = vsub.f32 %v570_v63, %v644_v33  ;;  %679 = vadd.xlane.f32.xlu1 %v678_v56  ;;  %v655_v47 = vsub.f32 %v3893_v0, %v647_v29 }
 0x4a0   :  { %v3915_v30 = vpop.eup %3500  ;;  %v668_v35 = vmul.f32 1.442695, %v654_v34  ;;  %v670_v48 = vmul.f32 1.442695, %v655_v47 }
 0x4a1   :  { %v770_v36 = vpop.permute.xlu0 %769  ;;  %v681_v37 = vsel %vm234_vm2, %v3915_v30, 0.0  ;;  %v818_v49 = vpop.permute.xlu1 %817 }
 0x4a2   :  { %v775_v38 = vsel %vm725_vm3, %v770_v36, 0  ;;  %682 = vadd.xlane.f32.xlu0 %v681_v37  ;;  %3504 = vpow2.f32 %v668_v35  ;;  %v823_v3 = vsel %vm725_vm3, %v818_v49, 0 }
 0x4a3   :  { %3187 = vmatpush3.bf16.msra.mxu0 %v775_v38  ;;  %3506 = vpow2.f32 %v666_v45 }
 0x4a4   :  { %3198 = vmatprep.subr.bf16.mxu0 %v3633_v15  ;;  %v3921_v39 = vpop.eup %3502  ;;  %3508 = vpow2.f32 %v670_v48 }
 0x4a5   :  { %v684_v40 = vsel %vm234_vm2, %v3921_v39, 0.0  ;;  %v866_v52 = vpop.permute.xlu1 %865 }
 0x4a6   :  { %685 = vadd.xlane.f32.xlu1 %v684_v40  ;;  %v871_v0 = vsel %vm725_vm3, %v866_v52, 0 }
 0x4ac   :  { %v3925_v41 = vpop.eup %3504 }
 0x4ad   :  { %v690_v43 = vsel %vm234_vm2, %v3925_v41, 0.0  ;;  %v3935_v54 = vpop.eup %3506 }
 0x4ae   :  { %691 = vadd.xlane.f32.xlu1 %v690_v43  ;;  %v3939_v58 = vpop.eup %3508 }
 0x4b8   :  { %961 = vrot.lane.b32.xlu0 %v3807_v55, %s3639_s27  ;;  %v687_v55 = vsel %vm234_vm2, %v3935_v54, 0.0 }
 0x4bf   :  { %1009 = vrot.lane.b32.xlu1 %v3819_v62, %s3639_s27  ;;  %v693_v62 = vsel %vm234_vm2, %v3939_v58, 0.0 }
 0x4d2   :  { %v677_v53 = vpop.xlane.xlu0 %676 }
 0x4d3   :  { %3510 = vrcp.f32 %v677_v53 }
 0x4d6   :  { %v674_v57 = vpop.xlane.xlu1 %673 }
 0x4d7   :  { %3512 = vrcp.f32 %v674_v57  ;;  %688 = vadd.xlane.f32.xlu0 %v687_v55 }
 0x4da   :  { %v914_v4 = vpop.permute.xlu1 %913 }
 0x4db   :  { %694 = vadd.xlane.f32.xlu0 %v693_v62  ;;  %v919_v12 = vsel %vm725_vm3, %v914_v4, 0 }
 0x4dd   :  { %v3511_v46 = vpop.eup %3510 }
 0x4de   :  { %v699_v59 = vmul.f32 %v3511_v46, %v3495_v18 }
 0x4e0   :  { %v713_v60 = vpack.c.bf16 %v699_v59, %v699_v59 }
 0x4e1   :  { %v3513_v63 = vpop.eup %3512 }
 0x4e2   :  { %v697_v1 = vmul.f32 %v3513_v63, %v3905_v20  ;;  %3189 = vmatmul.mubr.msk.bf16.vlgmr.msra.gmra.mrb[20].mxu0 %vm234_vm2, %v713_v60 }
 0x4e3   :  { %3199 = vmatpush3.bf16.msra.mxu0 %v871_v0  ;;  %3200 = vmatprep.mubr.msk.bf16.mxu0 %vm3634_vm1, %v3633_v15 }
 0x4e4   :  { %v712_v2 = vpack.c.bf16 %v697_v1, %v697_v1  ;;  %3210 = vmatprep.subr.bf16.mxu0 %v3633_v15  ;;  %v3470_v1 = vld [vmem:[%s4395_s6] sm:$0xff]  }
 0x4e6   :  { %3183 = vmatmul.mubr.msk.bf16.vlgmr.msra.gmra.mrb[16].mxu1 %vm234_vm2, %v712_v2 }
 0x4e7   :  { %3193 = vmatpush3.bf16.msra.mxu1 %v823_v3  ;;  %3194 = vmatprep.mubr.msk.bf16.mxu1 %vm3634_vm1, %v3633_v15  ;;  %v3471_v3 = vld [vmem:[%s4395_s6 + $0x8] sm:$0xff]  }
 0x4e8   :  { %3204 = vmatprep.subr.bf16.mxu1 %v3633_v15 }
 0x4f1   :  { %1057 = vrot.lane.b32.xlu0 %v3817_v61, %s3639_s27 }
 0x52b   :  { %v680_v5 = vpop.xlane.xlu1 %679 }
 0x52c   :  { %3514 = vrcp.f32 %v680_v5 }
 0x52f   :  { %v683_v6 = vpop.xlane.xlu0 %682 }
 0x530   :  { %3516 = vrcp.f32 %v683_v6 }
 0x533   :  { %v686_v7 = vpop.xlane.xlu1 %685  ;;  %v962_v17 = vpop.permute.xlu0 %961 }
 0x534   :  { %3518 = vrcp.f32 %v686_v7  ;;  %v967_v20 = vsel %vm725_vm3, %v962_v17, 0 }
 0x536   :  { %v3515_v8 = vpop.eup %3514 }
 0x537   :  { %v701_v9 = vmul.f32 %v3515_v8, %v3911_v28 }
 0x539   :  { %v714_v10 = vpack.c.bf16 %v701_v9, %v701_v9 }
 0x53a   :  { %v3517_v11 = vpop.eup %3516 }
 0x53b   :  { %v703_v14 = vmul.f32 %v3517_v11, %v3915_v30  ;;  %3195 = vmatmul.mubr.msk.bf16.vlgmr.msra.gmra.mrb[20].mxu1 %vm234_vm2, %v714_v10  ;;  %v692_v61 = vpop.xlane.xlu1 %691 }
 0x53c   :  { %3205 = vmatpush3.bf16.msra.mxu1 %v919_v12  ;;  %3206 = vmatprep.mubr.msk.bf16.mxu1 %vm3634_vm1, %v3633_v15  ;;  %3520 = vrcp.f32 %v692_v61 }
 0x53d   :  { %v715_v18 = vpack.c.bf16 %v703_v14, %v703_v14  ;;  %3216 = vmatprep.subr.bf16.mxu1 %v3633_v15 }
 0x53e   :  { %v3519_v19 = vpop.eup %3518 }
 0x53f   :  { %3201 = vmatmul.mubr.msk.bf16.vlgmr.msra.gmra.mrb[24].mxu0 %vm234_vm2, %v715_v18  ;;  %v705_v50 = vmul.f32 %v3519_v19, %v3921_v39  ;;  %v1010_v42 = vpop.permute.xlu1 %1009 }
 0x540   :  { %3211 = vmatpush3.bf16.msra.mxu0 %v967_v20  ;;  %3212 = vmatprep.mubr.msk.bf16.mxu0 %vm3634_vm1, %v3633_v15  ;;  %v1015_v16 = vsel %vm725_vm3, %v1010_v42, 0 }
 0x541   :  { %3222 = vmatprep.subr.bf16.mxu0 %v3633_v15  ;;  %v716_v51 = vpack.c.bf16 %v705_v50, %v705_v50 }
 0x543   :  { %3207 = vmatmul.mubr.msk.bf16.vlgmr.msra.gmra.mrb[24].mxu1 %vm234_vm2, %v716_v51 }
 0x544   :  { %3217 = vmatpush3.bf16.msra.mxu1 %v1015_v16  ;;  %3218 = vmatprep.mubr.msk.bf16.mxu1 %vm3634_vm1, %v3633_v15 }
 0x545   :  { %3228 = vmatprep.subr.bf16.mxu1 %v3633_v15 }
 0x546   :  { %v3521_v21 = vpop.eup %3520 }
 0x547   :  { %v709_v22 = vmul.f32 %v3521_v21, %v3925_v41 }
 0x549   :  { %v718_v23 = vpack.c.bf16 %v709_v22, %v709_v22 }
 0x54b   :  { %3219 = vmatmul.mubr.msk.bf16.vlgmr.msra.gmra.mrb[28].mxu1 %vm234_vm2, %v718_v23 }
 0x54c   :  { %3232 = vmatprep.mubr.msk.bf16.mxu1 %vm3634_vm1, %v3633_v15  ;;  %3229 = vmatpush3.bf16.msra.mxu1 %v3470_v1 }
 0x54d   :  { %3230 = vmatprep.subr.bf16.mxu1 %v3633_v15 }
 0x550   :  { %3231 = vmatpush3.bf16.msra.mxu1 %v3471_v3 }
 0x551   :  { %3244 = vmatprep.subr.bf16.mxu1 %v3633_v15 }
 0x564   :  { %v689_v24 = vpop.xlane.xlu0 %688 }
 0x565   :  { %3522 = vrcp.f32 %v689_v24 }
 0x568   :  { %v695_v25 = vpop.xlane.xlu0 %694 }
 0x569   :  { %3524 = vrcp.f32 %v695_v25 }
 0x56c   :  { %v1058_v28 = vpop.permute.xlu0 %1057 }
 0x56d   :  { %v1063_v56 = vsel %vm725_vm3, %v1058_v28, 0 }
 0x56f   :  { %v3523_v26 = vpop.eup %3522 }
 0x570   :  { %v707_v27 = vmul.f32 %v3523_v26, %v3935_v54 }
 0x572   :  { %v717_v29 = vpack.c.bf16 %v707_v27, %v707_v27  ;;  %v2941_v27 = vld [vmem:[%s4396_s7] ss:$0 sm:$0xff] }
 0x573   :  { %v3525_v33 = vpop.eup %3524 }
 0x574   :  { %3213 = vmatmul.mubr.msk.bf16.vlgmr.msra.gmra.mrb[28].mxu0 %vm234_vm2, %v717_v29  ;;  %v711_v34 = vmul.f32 %v3525_v33, %v3939_v58 }
 0x575   :  { %3223 = vmatpush3.bf16.msra.mxu0 %v1063_v56  ;;  %3224 = vmatprep.mubr.msk.bf16.mxu0 %vm3634_vm1, %v3633_v15 }
 0x576   :  { %3236 = vmatprep.subr.bf16.mxu0 %v3633_v15  ;;  %v719_v30 = vpack.c.bf16 %v711_v34, %v711_v34 }
 0x57c   :  { %3225 = vmatmul.mubr.msk.bf16.vlgmr.msra.gmra.mrb[32].mxu0 %vm234_vm2, %v719_v30 }
 0x57d   :  { %3240 = vmatprep.mubr.msk.bf16.mxu0 %vm3634_vm1, %v3633_v15 }
 0x5b5   :  { %v811_v35 = vpop.f32.mrb[20].mxu0 }
 0x5b6   :  { %v3190_v36 = vpop.f32.mrb[21].mxu0 }
 0x5b7   :  { %v814_v37 = vpop.f32.mrb[22].mxu0 }
 0x5b8   :  { %v3191_v38 = vpop.f32.mrb[23].mxu0 }
 0x5b9   :  { %v763_v39 = vpop.f32.mrb[16].mxu1 }
 0x5ba   :  { %v3184_v40 = vpop.f32.mrb[17].mxu1 }
 0x5bb   :  { %v766_v41 = vpop.f32.mrb[18].mxu1 }
 0x5bc   :  { %v3185_v43 = vpop.f32.mrb[19].mxu1 }
 0x60e   :  { %v859_v44 = vpop.f32.mrb[20].mxu1 }
 0x60f   :  { %v3196_v45 = vpop.f32.mrb[21].mxu1 }
 0x610   :  { %v862_v47 = vpop.f32.mrb[22].mxu1 }
 0x611   :  { %v3197_v48 = vpop.f32.mrb[23].mxu1 }
 0x612   :  { %v907_v49 = vpop.f32.mrb[24].mxu0 }
 0x613   :  { %v3423_v52 = vpack.i.bf16 %v907_v49, %v859_v44  ;;  %v3202_v53 = vpop.f32.mrb[25].mxu0 }
 0x614   :  { %v910_v54 = vpop.f32.mrb[26].mxu0 }
 0x615   :  { %v3203_v57 = vpop.f32.mrb[27].mxu0  ;;  %3424 = vrot.lane.b32.xlu1 %v3423_v52, %s3640_s19  ;;  %v3473_v52 = vld [vmem:[%s4399_s10 + $0x8] sm:$0xff]  }
 0x616   :  { %v955_v55 = vpop.f32.mrb[24].mxu1 }
 0x617   :  { %v3208_v58 = vpop.f32.mrb[25].mxu1 }
 0x618   :  { %v958_v62 = vpop.f32.mrb[26].mxu1 }
 0x619   :  { %v3209_v46 = vpop.f32.mrb[27].mxu1 }
 0x61e   :  { %v1051_v59 = vpop.f32.mrb[28].mxu1 }
 0x61f   :  { %v3220_v60 = vpop.f32.mrb[29].mxu1 }
 0x620   :  { %v1054_v63 = vpop.f32.mrb[30].mxu1  ;;  %v2945_v60 = vld [vmem:[%s4397_s8] ss:$0 sm:$0xff] }
 0x621   :  { %v3221_v0 = vpop.f32.mrb[31].mxu1 }
 0x647   :  { %v1003_v2 = vpop.f32.mrb[28].mxu0 }
 0x648   :  { %v3428_v4 = vpack.i.bf16 %v1003_v2, %v955_v55  ;;  %v3214_v5 = vpop.f32.mrb[29].mxu0  ;;  %v2946_v2 = vld [vmem:[%s4398_s9] ss:$0 sm:$0xff] }
 0x649   :  { %v1006_v6 = vpop.f32.mrb[30].mxu0 }
 0x64a   :  { %v3215_v7 = vpop.f32.mrb[31].mxu0  ;;  %3429 = vrot.lane.b32.xlu0 %v3428_v4, %s3641_s2 }
 0x64b   :  { %v3474_v7 = vld [vmem:[%s4401_s12] sm:$0xff]  }
 0x64f   :  { %v1099_v8 = vpop.f32.mrb[32].mxu0 }
 0x650   :  { %v3433_v9 = vpack.i.bf16 %v1099_v8, %v1051_v59  ;;  %v3226_v10 = vpop.f32.mrb[33].mxu0  ;;  %v3475_v8 = vld [vmem:[%s4401_s12 + $0x8] sm:$0xff]  }
 0x651   :  { %v1102_v11 = vpop.f32.mrb[34].mxu0  ;;  %v3477_v10 = vld [vmem:[%s4401_s12 + $0x18] sm:$0xff]  }
 0x652   :  { %v3227_v12 = vpop.f32.mrb[35].mxu0  ;;  %3434 = vrot.lane.b32.xlu1 %v3433_v9, %s4410_s29  ;;  %v3476_v9 = vld [vmem:[%s4401_s12 + $0x10] sm:$0xff]   ;;  %v2947_v11 = vld [vmem:[%s4400_s11] ss:$0 sm:$0xff] }
 0x687   :  { %v3425_v14 = vpop.permute.xlu1 %3424 }
 0x688   :  { %v3427_v61 = vunpack.i.h.bf16 %v3425_v14  ;;  %v3426_v18 = vunpack.i.l.bf16 %v3425_v14 }
 0x68a   :  { %v1130_v42 = vsel %vm234_vm2, %v811_v35, %v3427_v61  ;;  %v1129_v51 = vsel %vm234_vm2, %v763_v39, %v3426_v18 }
 0x6bc   :  { %v3430_v17 = vpop.permute.xlu0 %3429 }
 0x6bd   :  { %v3432_v19 = vunpack.i.h.bf16 %v3430_v17  ;;  %v3431_v20 = vunpack.i.l.bf16 %v3430_v17 }
 0x6bf   :  { %v1132_v22 = vsel %vm1131_vm4, %v1129_v51, %v3431_v20  ;;  %v1133_v23 = vsel %vm1131_vm4, %v1130_v42, %v3432_v19 }
 0x6c4   :  { %v3435_v50 = vpop.permute.xlu1 %3434 }
 0x6c5   :  { %v3437_v16 = vunpack.i.h.bf16 %v3435_v50  ;;  %v3436_v21 = vunpack.i.l.bf16 %v3435_v50 }
 0x6c7   :  { %v1135_v24 = vsel %vm1134_vm5, %v1132_v22, %v3436_v21  ;;  %v1136_v25 = vsel %vm1134_vm5, %v1133_v23, %v3437_v16 }
 0x6c8   :  { %v1137_v26 = vpack.c.bf16 %v1136_v25, %v1135_v24 }
 0x6ca   :  { %3233 = vmatmul.mubr.msk.bf16.vlgmr.msra.gmra.mrb[32].mxu1 %vm79_vm0, %v1137_v26 }
 0x6cb   :  { %3252 = vmatprep.mubr.msk.bf16.mxu1 %vm3634_vm1, %v3633_v15  ;;  %3245 = vmatpush3.bf16.msra.mxu1 %v3474_v7 }
 0x6cc   :  { %3246 = vmatprep.subr.bf16.mxu1 %v3633_v15 }
 0x6cf   :  { %3247 = vmatpush3.bf16.msra.mxu1 %v3475_v8 }
 0x6d0   :  { %3248 = vmatprep.subr.bf16.mxu1 %v3633_v15 }
 0x6d3   :  { %3249 = vmatpush3.bf16.msra.mxu1 %v3476_v9 }
 0x6d4   :  { %3250 = vmatprep.subr.bf16.mxu1 %v3633_v15 }
 0x6d7   :  { %3251 = vmatpush3.bf16.msra.mxu1 %v3477_v10  ;;  %v2958_v10 = vld [vmem:[%s4404_s15] ss:$0 sm:$0xff] }
 0x6d8   :  { %3270 = vmatprep.subr.bf16.mxu1 %v3633_v15 }
 0x79d   :  { %v1198_v28 = vpop.f32.mrb[32].mxu1 }
 0x79e   :  { %v1199_v29 = vadd.f32 %v2941_v27, %v1198_v28  ;;  %v3234_v33 = vpop.f32.mrb[33].mxu1 }
 0x79f   :  { %v1201_v56 = vpop.f32.mrb[34].mxu1 }
 0x7a0   :  { %v1202_v34 = vadd.f32 %v2941_v27, %v1201_v56  ;;  %v3235_v30 = vpop.f32.mrb[35].mxu1  ;;  %v1205_v35 = vadd.f32 %v1199_v29, %v3778_v31 }
 0x7a2   :  { %v1209_v36 = vsel %vm79_vm0, %v1205_v35, 0.0  ;;  %v1206_v37 = vadd.f32 %v1202_v34, %v3780_v32  ;;  %v3472_v32 = vld [vmem:[%s4399_s10] sm:$0xff]  }
 0x7a3   :  { %1210 = vadd.xlane.f32.xlu0 %v1209_v36  ;;  %3237 = vmatpush3.bf16.msra.mxu0 %v3472_v32  ;;  %v2951_v36 = vld [vmem:[%s4402_s13] ss:$0 sm:$0xff] }
 0x7a4   :  { %v1212_v38 = vsel %vm79_vm0, %v1206_v37, 0.0  ;;  %3238 = vmatprep.subr.bf16.mxu0 %v3633_v15 }
 0x7a5   :  { %1213 = vadd.xlane.f32.xlu1 %v1212_v38 }
 0x7a7   :  { %3239 = vmatpush3.bf16.msra.mxu0 %v3473_v52 }
 0x7a8   :  { %3256 = vmatprep.subr.bf16.mxu0 %v3633_v15 }
 0x830   :  { %v1211_v39 = vpop.xlane.xlu0 %1210 }
 0x831   :  { %v1215_v40 = vmul.f32 0.03125, %v1211_v39 }
 0x832   :  { %v1214_v41 = vpop.xlane.xlu1 %1213 }
 0x833   :  { %v1217_v43 = vsub.f32 %v1205_v35, %v1215_v40  ;;  %v1216_v44 = vmul.f32 0.03125, %v1214_v41 }
 0x835   :  { %v1218_v45 = vsub.f32 %v1206_v37, %v1216_v44  ;;  %v1219_v47 = vmul.f32 %v1217_v43, %v1217_v43 }
 0x837   :  { %v1221_v48 = vsel %vm79_vm0, %v1219_v47, 0.0  ;;  %v1220_v49 = vmul.f32 %v1218_v45, %v1218_v45 }
 0x838   :  { %1222 = vadd.xlane.f32.xlu0 %v1221_v48 }
 0x839   :  { %v1224_v31 = vsel %vm79_vm0, %v1220_v49, 0.0 }
 0x83c   :  { %1225 = vadd.xlane.f32.xlu0 %v1224_v31 }
 0x8c5   :  { %v1223_v53 = vpop.xlane.xlu0 %1222 }
 0x8c6   :  { %v1227_v54 = vmul.f32 0.03125, %v1223_v53 }
 0x8c8   :  { %v1229_v57 = vadd.f32 1e-12, %v1227_v54 }
 0x8c9   :  { %v1226_v55 = vpop.xlane.xlu0 %1225 }
 0x8ca   :  { %3526 = vrsqrt.f32 %v1229_v57  ;;  %v1228_v58 = vmul.f32 0.03125, %v1226_v55 }
 0x8cc   :  { %v1230_v62 = vadd.f32 1e-12, %v1228_v58 }
 0x8ce   :  { %3528 = vrsqrt.f32 %v1230_v62 }
 0x8d4   :  { %v3527_v46 = vpop.eup %3526 }
 0x8d5   :  { %v1233_v59 = vmul.f32 %v3527_v46, %v1217_v43  ;;  %v3478_v46 = vld [vmem:[%s4393_s4 + $0x10] sm:$0xff]  }
 0x8d7   :  { %v1241_v0 = vmul.f32 %v2945_v60, %v1233_v59  ;;  %v3479_v59 = vld [vmem:[%s4393_s4 + $0x18] sm:$0xff]  }
 0x8d8   :  { %v3529_v63 = vpop.eup %3528 }
 0x8d9   :  { %v1234_v1 = vmul.f32 %v3529_v63, %v1218_v45  ;;  %v1249_v4 = vadd.f32 %v2946_v2, %v1241_v0 }
 0x8db   :  { %v1242_v3 = vmul.f32 %v2945_v60, %v1234_v1 }
 0x8dd   :  { %v1250_v5 = vadd.f32 %v2946_v2, %v1242_v3 }
 0x8df   :  { %v1251_v6 = vpack.c.bf16 %v1250_v5, %v1249_v4 }
 0x8e1   :  { %3241 = vmatmul.mubr.msk.bf16.vlgmr.msra.gmra.mrb[36].mxu0 %vm79_vm0, %v1251_v6 }
 0x8e2   :  { %3260 = vmatprep.mubr.msk.bf16.mxu0 %vm3634_vm1, %v3633_v15  ;;  %3257 = vmatpush3.bf16.msra.mxu0 %v3478_v46 }
 0x8e3   :  { %3258 = vmatprep.subr.bf16.mxu0 %v3633_v15 }
 0x8e6   :  { %3259 = vmatpush3.bf16.msra.mxu0 %v3479_v59 }
 0x8e7   :  { %3264 = vmatprep.subr.bf16.mxu0 %v3633_v15 }
 0x9b4   :  { %v1312_v12 = vpop.f32.mrb[36].mxu0 }
 0x9b5   :  { %v1313_v14 = vadd.f32 %v2947_v11, %v1312_v12  ;;  %v3242_v17 = vpop.f32.mrb[37].mxu0 }
 0x9b6   :  { %v1315_v61 = vpop.f32.mrb[38].mxu0 }
 0x9b7   :  { %v1321_v18 = vmul.f32 0.044715, %v1313_v14  ;;  %v1316_v19 = vadd.f32 %v2947_v11, %v1315_v61  ;;  %v3243_v20 = vpop.f32.mrb[39].mxu0  ;;  %v1319_v29 = vmul.f32 0.5, %v1313_v14  ;;  %v2964_v61 = vld [vmem:[%s4394_s5 + $0x1] ss:$0 sm:$0xff] }
 0x9b9   :  { %v1323_v50 = vmul.f32 %v1321_v18, %v1313_v14  ;;  %v1322_v42 = vmul.f32 0.044715, %v1316_v19  ;;  %v1320_v33 = vmul.f32 0.5, %v1316_v19 }
 0x9bb   :  { %v1325_v51 = vmul.f32 %v1323_v50, %v1313_v14  ;;  %v1324_v16 = vmul.f32 %v1322_v42, %v1316_v19 }
 0x9bd   :  { %v1327_v21 = vadd.f32 %v1325_v51, %v1313_v14  ;;  %v1326_v22 = vmul.f32 %v1324_v16, %v1316_v19 }
 0x9bf   :  { %v1329_v23 = vmul.f32 0.7978846, %v1327_v21  ;;  %v1328_v24 = vadd.f32 %v1326_v22, %v1316_v19 }
 0x9c1   :  { %3530 = vtanh.f32 %v1329_v23  ;;  %v1330_v25 = vmul.f32 0.7978846, %v1328_v24 }
 0x9c3   :  { %3532 = vtanh.f32 %v1330_v25 }
 0x9cb   :  { %v3531_v26 = vpop.eup %3530 }
 0x9cc   :  { %v1333_v27 = vadd.f32 1.0, %v3531_v26 }
 0x9cd   :  { %v3533_v28 = vpop.eup %3532 }
 0x9ce   :  { %v1334_v56 = vadd.f32 1.0, %v3533_v28  ;;  %v1335_v34 = vmul.f32 %v1333_v27, %v1319_v29 }
 0x9d0   :  { %v1336_v30 = vmul.f32 %v1334_v56, %v1320_v33 }
 0x9d2   :  { %v1337_v35 = vpack.c.bf16 %v1336_v30, %v1335_v34 }
 0x9d4   :  { %3253 = vmatmul.mubr.msk.bf16.vlgmr.msra.gmra.mrb[36].mxu1 %vm1377_vm6, %v1337_v35 }
 0x9d5   :  { %3272 = vmatprep.mubr.msk.bf16.mxu1 %vm3634_vm1, %v3633_v15 }
 0xaa7   :  { %v1415_v37 = vpop.f32.mrb[36].mxu1 }
 0xaa8   :  { %v1416_v38 = vadd.f32 %v2951_v36, %v1415_v37  ;;  %v3254_v39 = vpop.f32.mrb[37].mxu1 }
 0xaa9   :  { %v1418_v40 = vpop.f32.mrb[38].mxu1 }
 0xaaa   :  { %v1419_v41 = vadd.f32 %v2951_v36, %v1418_v40  ;;  %v3255_v43 = vpop.f32.mrb[39].mxu1  ;;  %v1422_v44 = vadd.f32 %v1416_v38, %v1249_v4 }
 0xaac   :  { %v1426_v45 = vsel %vm79_vm0, %v1422_v44, 0.0  ;;  %v1423_v47 = vadd.f32 %v1419_v41, %v1250_v5  ;;  %v2957_v5 = vld [vmem:[%s4403_s14] ss:$0 sm:$0xff] }
 0xaad   :  { %1427 = vadd.xlane.f32.xlu0 %v1426_v45 }
 0xaae   :  { %v1429_v48 = vsel %vm79_vm0, %v1423_v47, 0.0 }
 0xaaf   :  { %1430 = vadd.xlane.f32.xlu1 %v1429_v48 }
 0xb3a   :  { %v1428_v49 = vpop.xlane.xlu0 %1427 }
 0xb3b   :  { %v1432_v31 = vmul.f32 0.03125, %v1428_v49 }
 0xb3c   :  { %v1431_v32 = vpop.xlane.xlu1 %1430 }
 0xb3d   :  { %v1434_v52 = vsub.f32 %v1422_v44, %v1432_v31  ;;  %v1433_v53 = vmul.f32 0.03125, %v1431_v32 }
 0xb3f   :  { %v1435_v54 = vsub.f32 %v1423_v47, %v1433_v53  ;;  %v1436_v57 = vmul.f32 %v1434_v52, %v1434_v52 }
 0xb41   :  { %v1438_v55 = vsel %vm79_vm0, %v1436_v57, 0.0  ;;  %v1437_v58 = vmul.f32 %v1435_v54, %v1435_v54 }
 0xb42   :  { %1439 = vadd.xlane.f32.xlu0 %v1438_v55 }
 0xb43   :  { %v1441_v62 = vsel %vm79_vm0, %v1437_v58, 0.0 }
 0xb44   :  { %1442 = vadd.xlane.f32.xlu1 %v1441_v62 }
 0xbcf   :  { %v1440_v60 = vpop.xlane.xlu0 %1439 }
 0xbd0   :  { %v1444_v63 = vmul.f32 0.03125, %v1440_v60 }
 0xbd1   :  { %v1443_v0 = vpop.xlane.xlu1 %1442 }
 0xbd2   :  { %v1446_v1 = vadd.f32 1e-12, %v1444_v63  ;;  %v1445_v2 = vmul.f32 0.03125, %v1443_v0 }
 0xbd4   :  { %3534 = vrsqrt.f32 %v1446_v1  ;;  %v1447_v3 = vadd.f32 1e-12, %v1445_v2 }
 0xbd6   :  { %3536 = vrsqrt.f32 %v1447_v3  ;;  %v3582_v3 = vld [vmem:[%s4416_s3] ss:$0 sm:$0xff] }
 0xbde   :  { %v3535_v4 = vpop.eup %3534 }
 0xbdf   :  { %v1450_v6 = vmul.f32 %v3535_v4, %v1434_v52 }
 0xbe0   :  { %v3537_v7 = vpop.eup %3536 }
 0xbe1   :  { %v1458_v8 = vmul.f32 %v2957_v5, %v1450_v6  ;;  %v1451_v9 = vmul.f32 %v3537_v7, %v1435_v54 }
 0xbe3   :  { %v1459_v11 = vmul.f32 %v2957_v5, %v1451_v9  ;;  %v4077_v12 = vadd.f32 %v2958_v10, %v1458_v8 }
 0xbe5   :  { %v4079_v14 = vadd.f32 %v2958_v10, %v1459_v11 }
 0xbe7   :  { %v1468_v17 = vpack.c.bf16 %v4079_v14, %v4077_v12 }
 0xbe9   :  { %3261 = vmatmul.mubr.msk.bf16.vlgmr.msra.gmra.mrb[40].mxu0 %vm79_vm0, %v1468_v17 }
 0xbea   :  { %3266 = vmatprep.mubr.msk.bf16.mxu0 %vm3634_vm1, %v3633_v15 }
 0xcbc   :  { %v1531_v18 = vpop.f32.mrb[40].mxu0 }
 0xcbd   :  { %v3262_v19 = vpop.f32.mrb[41].mxu0  ;;  %v1532_v50 = vadd.f32 %v2964_v61, %v1531_v18 }
 0xcbe   :  { %v1534_v20 = vpop.f32.mrb[42].mxu0  ;;  %v3583_v19 = vld [vmem:[%s4416_s3 + $0x1] ss:$0 sm:$0xff] }
 0xcbf   :  { %v1535_v42 = vadd.f32 %v2964_v61, %v1534_v20  ;;  %v3263_v51 = vpop.f32.mrb[43].mxu0  ;;  %v1558_v22 = vpack.c.bf16 %v1532_v50, %v1532_v50 }
 0xcc1   :  { %v3443_v16 = vpack.i.bf16 %v1535_v42, %v1532_v50  ;;  %v4091_v21 = vpack.c.bf16 %v1535_v42, %v1535_v42 }
 0xcc3   :  { %3444 = vrot.lane.b32.xlu1 %v3443_v16, %s3635_s23  ;;  %3439 = vrot.lane.b32.xlu0 %v3443_v16, %s3636_s24 }
 0xcc7   :  { %3449 = vrot.lane.b32.xlu1 %v3443_v16, %s3637_s25  ;;  %1616 = vrot.lane.b32.xlu0 %v4091_v21, %s3638_s26 }
 0xccb   :  { %1567 = vrot.lane.b32.xlu1 %v1558_v22, %s3638_s26 }
 0xd35   :  { %v3445_v23 = vpop.permute.xlu1 %3444  ;;  %v3440_v24 = vpop.permute.xlu0 %3439 }
 0xd36   :  { %v3442_v25 = vunpack.i.h.bf16 %v3440_v24  ;;  %v3441_v26 = vunpack.i.l.bf16 %v3440_v24  ;;  %v3447_v27 = vunpack.i.h.bf16 %v3445_v23  ;;  %v3446_v28 = vunpack.i.l.bf16 %v3445_v23 }
 0xd38   :  { %v4097_v29 = vpack.c.bf16 %v3442_v25, %v3442_v25  ;;  %v4099_v33 = vpack.c.bf16 %v3441_v26, %v3441_v26  ;;  %v4106_v35 = vpack.c.bf16 %v3447_v27, %v3447_v27  ;;  %v4108_v36 = vpack.c.bf16 %v3446_v28, %v3446_v28 }
 0xd39   :  { %v3450_v56 = vpop.permute.xlu1 %3449  ;;  %v1617_v34 = vpop.permute.xlu0 %1616 }
 0xd3a   :  { %v1622_v30 = vsel %vm234_vm2, %v1617_v34, 0  ;;  %1665 = vrot.lane.b32.xlu1 %v4099_v33, %s3638_s26  ;;  %1714 = vrot.lane.b32.xlu0 %v4097_v29, %s3638_s26  ;;  %v3452_v37 = vunpack.i.h.bf16 %v3450_v56  ;;  %v3451_v38 = vunpack.i.l.bf16 %v3450_v56 }
 0xd3b   :  { %3271 = vmatpush3.bf16.xpose.msra.mxu1 %v1622_v30 }
 0xd3c   :  { %3282 = vmatprep.subr.bf16.mxu1 %v3633_v15  ;;  %v4116_v41 = vpack.c.bf16 %v3452_v37, %v3452_v37  ;;  %v4118_v43 = vpack.c.bf16 %v3451_v38, %v3451_v38 }
 0xd3d   :  { %v1568_v39 = vpop.permute.xlu1 %1567 }
 0xd3e   :  { %v1573_v40 = vsel %vm234_vm2, %v1568_v39, 0  ;;  %1763 = vrot.lane.b32.xlu1 %v4108_v36, %s3638_s26  ;;  %1812 = vrot.lane.b32.xlu0 %v4106_v35, %s3638_s26 }
 0xd3f   :  { %3265 = vmatpush3.bf16.xpose.msra.mxu0 %v1573_v40 }
 0xd40   :  { %3276 = vmatprep.subr.bf16.mxu0 %v3633_v15 }
 0xd42   :  { %1861 = vrot.lane.b32.xlu1 %v4118_v43, %s3638_s26  ;;  %1910 = vrot.lane.b32.xlu0 %v4116_v41, %s3638_s26 }
 0xd43   :  { %3273 = vmatmul.mubr.msk.bf16.vlgmr.msra.gmra.mrb[40].mxu1 %vm234_vm2, %v4091_v21 }
 0xd44   :  { %3284 = vmatprep.mubr.msk.bf16.mxu1 %vm3634_vm1, %v3633_v15 }
 0xd46   :  { %3267 = vmatmul.mubr.msk.bf16.vlgmr.msra.gmra.mrb[44].mxu0 %vm234_vm2, %v1558_v22  ;;  %2054 = vrot.lane.b32.xlu1 %v1558_v22, %s3639_s27 }
 0xd47   :  { %3278 = vmatprep.mubr.msk.bf16.mxu0 %vm3634_vm1, %v3633_v15 }
 0xdac   :  { %v1666_v44 = vpop.permute.xlu1 %1665  ;;  %v1715_v45 = vpop.permute.xlu0 %1714 }
 0xdad   :  { %v1671_v47 = vsel %vm234_vm2, %v1666_v44, 0  ;;  %v1720_v48 = vsel %vm234_vm2, %v1715_v45, 0 }
 0xdae   :  { %3277 = vmatpush3.bf16.xpose.msra.mxu0 %v1671_v47  ;;  %3283 = vmatpush3.bf16.xpose.msra.mxu1 %v1720_v48 }
 0xdaf   :  { %3288 = vmatprep.subr.bf16.mxu0 %v3633_v15  ;;  %3294 = vmatprep.subr.bf16.mxu1 %v3633_v15 }
 0xdb0   :  { %v1764_v49 = vpop.permute.xlu1 %1763  ;;  %v1813_v31 = vpop.permute.xlu0 %1812 }
 0xdb1   :  { %v1769_v32 = vsel %vm234_vm2, %v1764_v49, 0  ;;  %v1818_v52 = vsel %vm234_vm2, %v1813_v31, 0 }
 0xdb4   :  { %v1862_v53 = vpop.permute.xlu1 %1861  ;;  %v1911_v54 = vpop.permute.xlu0 %1910 }
 0xdb5   :  { %3279 = vmatmul.mubr.msk.bf16.vlgmr.msra.gmra.mrb[48].mxu0 %vm234_vm2, %v4099_v33  ;;  %3285 = vmatmul.mubr.msk.bf16.vlgmr.msra.gmra.mrb[44].mxu1 %vm234_vm2, %v4097_v29  ;;  %v1867_v57 = vsel %vm234_vm2, %v1862_v53, 0  ;;  %v1916_v55 = vsel %vm234_vm2, %v1911_v54, 0 }
 0xdb6   :  { %3289 = vmatpush3.bf16.xpose.msra.mxu0 %v1769_v32  ;;  %3295 = vmatpush3.bf16.xpose.msra.mxu1 %v1818_v52 }
 0xdb7   :  { %3290 = vmatprep.mubr.msk.bf16.mxu0 %vm3634_vm1, %v3633_v15  ;;  %3296 = vmatprep.mubr.msk.bf16.mxu1 %vm3634_vm1, %v3633_v15 }
 0xdb8   :  { %3300 = vmatprep.subr.bf16.mxu0 %v3633_v15  ;;  %3306 = vmatprep.subr.bf16.mxu1 %v3633_v15  ;;  %v2055_v58 = vpop.permute.xlu1 %2054 }
 0xdb9   :  { %v2060_v62 = vsel %vm725_vm3, %v2055_v58, 0 }
 0xdbd   :  { %3291 = vmatmul.mubr.msk.bf16.vlgmr.msra.gmra.mrb[52].mxu0 %vm234_vm2, %v4108_v36  ;;  %3297 = vmatmul.mubr.msk.bf16.vlgmr.msra.gmra.mrb[48].mxu1 %vm234_vm2, %v4106_v35 }
 0xdbe   :  { %3301 = vmatpush3.bf16.xpose.msra.mxu0 %v1867_v57  ;;  %3307 = vmatpush3.bf16.xpose.msra.mxu1 %v1916_v55 }
 0xdbf   :  { %3302 = vmatprep.mubr.msk.bf16.mxu0 %vm3634_vm1, %v3633_v15  ;;  %3308 = vmatprep.mubr.msk.bf16.mxu1 %vm3634_vm1, %v3633_v15 }
 0xdc0   :  { %3312 = vmatprep.subr.bf16.mxu0 %v3633_v15  ;;  %3318 = vmatprep.subr.bf16.mxu1 %v3633_v15 }
 0xdc5   :  { %3303 = vmatmul.mubr.msk.bf16.vlgmr.msra.gmra.mrb[56].mxu0 %vm234_vm2, %v4118_v43  ;;  %3309 = vmatmul.mubr.msk.bf16.vlgmr.msra.gmra.mrb[52].mxu1 %vm234_vm2, %v4116_v41 }
 0xdc6   :  { %3313 = vmatpush3.bf16.msra.mxu0 %v2060_v62  ;;  %3320 = vmatprep.mubr.msk.bf16.mxu1 %vm3634_vm1, %v3633_v15 }
 0xdc7   :  { %3314 = vmatprep.mubr.msk.bf16.mxu0 %vm3634_vm1, %v3633_v15  ;;  %3324 = vmatprep.subr.bf16.mxu0 %v3633_v15 }
 0xe16   :  { %v1658_v46 = vpop.f32.mrb[40].mxu1 }
 0xe17   :  { %v4172_v59 = vadd.f32 %v3875_v13, %v1658_v46  ;;  %v3274_v60 = vpop.f32.mrb[41].mxu1 }
 0xe18   :  { %v1661_v63 = vpop.f32.mrb[42].mxu1 }
 0xe19   :  { %v3275_v0 = vpop.f32.mrb[43].mxu1  ;;  %v1609_v1 = vpop.f32.mrb[44].mxu0  ;;  %v1961_v2 = vsel %vm234_vm2, %v4172_v59, -inf }
 0xe1a   :  { %v1610_v4 = vadd.f32 %v3582_v3, %v1609_v1  ;;  %1962 = vmax.xlane.f32.xlu0 %v1961_v2  ;;  %v3268_v5 = vpop.f32.mrb[45].mxu0 }
 0xe1b   :  { %v1612_v6 = vpop.f32.mrb[46].mxu0 }
 0xe1c   :  { %v3269_v7 = vpop.f32.mrb[47].mxu0  ;;  %v1958_v8 = vsel %vm234_vm2, %v1610_v4, -inf }
 0xe1d   :  { %1959 = vmax.xlane.f32.xlu1 %v1958_v8 }
 0xe88   :  { %v1707_v13 = vpop.f32.mrb[48].mxu0  ;;  %v1756_v9 = vpop.f32.mrb[44].mxu1 }
 0xe89   :  { %v1708_v10 = vadd.f32 %v3582_v3, %v1707_v13  ;;  %v3280_v11 = vpop.f32.mrb[49].mxu0  ;;  %v3286_v17 = vpop.f32.mrb[45].mxu1  ;;  %v1757_v20 = vadd.f32 %v3583_v19, %v1756_v9 }
 0xe8a   :  { %v1710_v61 = vpop.f32.mrb[50].mxu0  ;;  %v1759_v18 = vpop.f32.mrb[46].mxu1 }
 0xe8b   :  { %v3281_v50 = vpop.f32.mrb[51].mxu0  ;;  %v3287_v42 = vpop.f32.mrb[47].mxu1  ;;  %v1964_v51 = vsel %vm234_vm2, %v1708_v10, -inf  ;;  %v1967_v16 = vsel %vm234_vm2, %v1757_v20, -inf }
 0xe8c   :  { %1965 = vmax.xlane.f32.xlu0 %v1964_v51 }
 0xe90   :  { %v1805_v22 = vpop.f32.mrb[52].mxu0  ;;  %1968 = vmax.xlane.f32.xlu0 %v1967_v16  ;;  %v1854_v23 = vpop.f32.mrb[48].mxu1 }
 0xe91   :  { %v1806_v24 = vadd.f32 %v3582_v3, %v1805_v22  ;;  %v4185_v25 = vadd.f32 %v3583_v19, %v1854_v23  ;;  %v3292_v26 = vpop.f32.mrb[53].mxu0  ;;  %v3298_v27 = vpop.f32.mrb[49].mxu1 }
 0xe92   :  { %v1808_v28 = vpop.f32.mrb[54].mxu0  ;;  %v1857_v56 = vpop.f32.mrb[50].mxu1 }
 0xe93   :  { %v3293_v34 = vpop.f32.mrb[55].mxu0  ;;  %v3299_v30 = vpop.f32.mrb[51].mxu1  ;;  %v1970_v37 = vsel %vm234_vm2, %v1806_v24, -inf  ;;  %v1973_v38 = vsel %vm234_vm2, %v4185_v25, -inf }
 0xe94   :  { %1971 = vmax.xlane.f32.xlu1 %v1970_v37  ;;  %1974 = vmax.xlane.f32.xlu0 %v1973_v38 }
 0xe98   :  { %v1903_v39 = vpop.f32.mrb[56].mxu0  ;;  %v1952_v40 = vpop.f32.mrb[52].mxu1 }
 0xe99   :  { %v1904_v44 = vadd.f32 %v3582_v3, %v1903_v39  ;;  %v4190_v45 = vadd.f32 %v3583_v19, %v1952_v40  ;;  %v3304_v47 = vpop.f32.mrb[57].mxu0  ;;  %v3310_v48 = vpop.f32.mrb[53].mxu1 }
 0xe9a   :  { %v1906_v49 = vpop.f32.mrb[58].mxu0  ;;  %v1955_v31 = vpop.f32.mrb[54].mxu1 }
 0xe9b   :  { %v3305_v32 = vpop.f32.mrb[59].mxu0  ;;  %v3311_v52 = vpop.f32.mrb[55].mxu1  ;;  %v1976_v53 = vsel %vm234_vm2, %v1904_v44, -inf  ;;  %v1979_v54 = vsel %vm234_vm2, %v4190_v45, -inf }
 0xe9c   :  { %1977 = vmax.xlane.f32.xlu1 %v1976_v53  ;;  %1980 = vmax.xlane.f32.xlu0 %v1979_v54 }
 0xea7   :  { %v1963_v57 = vpop.xlane.xlu0 %1962 }
 0xea8   :  { %v1983_v55 = vsub.f32 %v4172_v59, %v1963_v57 }
 0xeaa   :  { %v1960_v58 = vpop.xlane.xlu1 %1959  ;;  %v1992_v62 = vmul.f32 1.442695, %v1983_v55 }
 0xeab   :  { %v1982_v46 = vsub.f32 %v1610_v4, %v1960_v58 }
 0xeac   :  { %3538 = vpow2.f32 %v1992_v62 }
 0xead   :  { %2150 = vrot.lane.b32.xlu1 %v4099_v33, %s3639_s27  ;;  %v1990_v60 = vmul.f32 1.442695, %v1982_v46 }
 0xeaf   :  { %3540 = vpow2.f32 %v1990_v60 }
 0xeb1   :  { %2198 = vrot.lane.b32.xlu1 %v4097_v29, %s3639_s27 }
 0xeb2   :  { %2102 = vrot.lane.b32.xlu0 %v4091_v21, %s3639_s27 }
 0xeb6   :  { %v3539_v63 = vpop.eup %3538 }
 0xeb7   :  { %v2009_v0 = vsel %vm234_vm2, %v3539_v63, 0.0 }
 0xeb9   :  { %v4203_v1 = vpop.eup %3540 }
 0xeba   :  { %v2006_v29 = vsel %vm234_vm2, %v4203_v1, 0.0 }
 0xed1   :  { %2010 = vadd.xlane.f32.xlu0 %v2009_v0 }
 0xed5   :  { %2007 = vadd.xlane.f32.xlu1 %v2006_v29 }
 0xee6   :  { %2246 = vrot.lane.b32.xlu1 %v4108_v36, %s3639_s27 }
 0xf19   :  { %v1966_v21 = vpop.xlane.xlu0 %1965 }
 0xf1a   :  { %v1984_v33 = vsub.f32 %v1708_v10, %v1966_v21 }
 0xf1c   :  { %v1994_v59 = vmul.f32 1.442695, %v1984_v33 }
 0xf1d   :  { %v1969_v2 = vpop.xlane.xlu0 %1968 }
 0xf1e   :  { %3542 = vpow2.f32 %v1994_v59  ;;  %v1985_v3 = vsub.f32 %v1757_v20, %v1969_v2 }
 0xf20   :  { %v1996_v4 = vmul.f32 1.442695, %v1985_v3 }
 0xf21   :  { %v1972_v5 = vpop.xlane.xlu1 %1971  ;;  %v1975_v8 = vpop.xlane.xlu0 %1974 }
 0xf22   :  { %3544 = vpow2.f32 %v1996_v4  ;;  %v1986_v6 = vsub.f32 %v1806_v24, %v1972_v5  ;;  %v1987_v22 = vsub.f32 %v4185_v25, %v1975_v8 }
 0xf24   :  { %v1998_v7 = vmul.f32 1.442695, %v1986_v6  ;;  %v2000_v23 = vmul.f32 1.442695, %v1987_v22 }
 0xf26   :  { %3546 = vpow2.f32 %v1998_v7 }
 0xf28   :  { %v4209_v13 = vpop.eup %3542 }
 0xf29   :  { %v1978_v9 = vpop.xlane.xlu1 %1977  ;;  %v1981_v11 = vpop.xlane.xlu0 %1980  ;;  %v2012_v36 = vsel %vm234_vm2, %v4209_v13, 0.0 }
 0xf2a   :  { %v1988_v17 = vsub.f32 %v1904_v44, %v1978_v9  ;;  %2013 = vadd.xlane.f32.xlu1 %v2012_v36  ;;  %v1989_v24 = vsub.f32 %v4190_v45, %v1981_v11 }
 0xf2c   :  { %v4213_v10 = vpop.eup %3544  ;;  %v2002_v61 = vmul.f32 1.442695, %v1988_v17  ;;  %v2004_v26 = vmul.f32 1.442695, %v1989_v24 }
 0xf2d   :  { %v2103_v18 = vpop.permute.xlu0 %2102  ;;  %v2015_v19 = vsel %vm234_vm2, %v4213_v10, 0.0  ;;  %v2151_v27 = vpop.permute.xlu1 %2150 }
 0xf2e   :  { %3548 = vpow2.f32 %v2002_v61  ;;  %v2108_v20 = vsel %vm725_vm3, %v2103_v18, 0  ;;  %2016 = vadd.xlane.f32.xlu0 %v2015_v19  ;;  %v2156_v48 = vsel %vm725_vm3, %v2151_v27, 0 }
 0xf2f   :  { %3319 = vmatpush3.bf16.msra.mxu1 %v2108_v20  ;;  %3550 = vpow2.f32 %v2000_v23 }
 0xf30   :  { %v4218_v50 = vpop.eup %3546  ;;  %3330 = vmatprep.subr.bf16.mxu1 %v3633_v15  ;;  %3552 = vpow2.f32 %v2004_v26 }
 0xf31   :  { %v2018_v42 = vsel %vm234_vm2, %v4218_v50, 0.0  ;;  %v2199_v28 = vpop.permute.xlu1 %2198 }
 0xf32   :  { %2019 = vadd.xlane.f32.xlu1 %v2018_v42  ;;  %v2204_v44 = vsel %vm725_vm3, %v2199_v28, 0 }
 0xf38   :  { %v4223_v51 = vpop.eup %3548 }
 0xf39   :  { %v2024_v16 = vsel %vm234_vm2, %v4223_v51, 0.0  ;;  %v4233_v34 = vpop.eup %3550 }
 0xf3a   :  { %2025 = vadd.xlane.f32.xlu1 %v2024_v16  ;;  %v4237_v37 = vpop.eup %3552 }
 0xf44   :  { %2294 = vrot.lane.b32.xlu0 %v4106_v35, %s3639_s27  ;;  %v2021_v35 = vsel %vm234_vm2, %v4233_v34, 0.0 }
 0xf4b   :  { %2342 = vrot.lane.b32.xlu1 %v4118_v43, %s3639_s27  ;;  %v2027_v43 = vsel %vm234_vm2, %v4237_v37, 0.0 }
 0xf5e   :  { %v2011_v56 = vpop.xlane.xlu0 %2010 }
 0xf5f   :  { %3554 = vrcp.f32 %v2011_v56 }
 0xf62   :  { %v2008_v30 = vpop.xlane.xlu1 %2007 }
 0xf63   :  { %3556 = vrcp.f32 %v2008_v30  ;;  %2022 = vadd.xlane.f32.xlu0 %v2021_v35 }
 0xf66   :  { %v2247_v49 = vpop.permute.xlu1 %2246 }
 0xf67   :  { %2028 = vadd.xlane.f32.xlu0 %v2027_v43  ;;  %v2252_v58 = vsel %vm725_vm3, %v2247_v49, 0 }
 0xf69   :  { %v3555_v25 = vpop.eup %3554 }
 0xf6a   :  { %v2033_v38 = vmul.f32 %v3555_v25, %v3539_v63 }
 0xf6c   :  { %v2047_v39 = vpack.c.bf16 %v2033_v38, %v2033_v38 }
 0xf6d   :  { %v3557_v40 = vpop.eup %3556 }
 0xf6e   :  { %v2031_v45 = vmul.f32 %v3557_v40, %v4203_v1  ;;  %3321 = vmatmul.mubr.msk.bf16.vlgmr.msra.gmra.mrb[56].mxu1 %vm234_vm2, %v2047_v39 }
 0xf6f   :  { %3331 = vmatpush3.bf16.msra.mxu1 %v2204_v44  ;;  %3332 = vmatprep.mubr.msk.bf16.mxu1 %vm3634_vm1, %v3633_v15  ;;  %v3480_v44 = vld [vmem:[%s4395_s6 + $0x10] sm:$0xff]  }
 0xf70   :  { %v2046_v47 = vpack.c.bf16 %v2031_v45, %v2031_v45  ;;  %3342 = vmatprep.subr.bf16.mxu1 %v3633_v15 }
 0xf72   :  { %3315 = vmatmul.mubr.msk.bf16.vlgmr.msra.gmra.mrb[60].mxu0 %vm234_vm2, %v2046_v47  ;;  %v3481_v47 = vld [vmem:[%s4395_s6 + $0x18] sm:$0xff]  }
 0xf73   :  { %3325 = vmatpush3.bf16.msra.mxu0 %v2156_v48  ;;  %3326 = vmatprep.mubr.msk.bf16.mxu0 %vm3634_vm1, %v3633_v15 }
 0xf74   :  { %3336 = vmatprep.subr.bf16.mxu0 %v3633_v15 }
 0xf7d   :  { %2390 = vrot.lane.b32.xlu0 %v4116_v41, %s3639_s27 }
 0xfb7   :  { %v2014_v31 = vpop.xlane.xlu1 %2013 }
 0xfb8   :  { %3558 = vrcp.f32 %v2014_v31 }
 0xfbb   :  { %v2017_v32 = vpop.xlane.xlu0 %2016 }
 0xfbc   :  { %3560 = vrcp.f32 %v2017_v32 }
 0xfbf   :  { %v2020_v52 = vpop.xlane.xlu1 %2019  ;;  %v2295_v41 = vpop.permute.xlu0 %2294 }
 0xfc0   :  { %3562 = vrcp.f32 %v2020_v52  ;;  %v2300_v1 = vsel %vm725_vm3, %v2295_v41, 0 }
 0xfc2   :  { %v3559_v53 = vpop.eup %3558 }
 0xfc3   :  { %v2035_v54 = vmul.f32 %v3559_v53, %v4209_v13 }
 0xfc5   :  { %v2048_v57 = vpack.c.bf16 %v2035_v54, %v2035_v54 }
 0xfc6   :  { %v3561_v55 = vpop.eup %3560 }
 0xfc7   :  { %v2037_v62 = vmul.f32 %v3561_v55, %v4213_v10  ;;  %3327 = vmatmul.mubr.msk.bf16.vlgmr.msra.gmra.mrb[64].mxu0 %vm234_vm2, %v2048_v57  ;;  %v2026_v46 = vpop.xlane.xlu1 %2025 }
 0xfc8   :  { %3337 = vmatpush3.bf16.msra.mxu0 %v2252_v58  ;;  %3564 = vrcp.f32 %v2026_v46  ;;  %3338 = vmatprep.mubr.msk.bf16.mxu0 %vm3634_vm1, %v3633_v15 }
 0xfc9   :  { %v2049_v60 = vpack.c.bf16 %v2037_v62, %v2037_v62  ;;  %3348 = vmatprep.subr.bf16.mxu0 %v3633_v15 }
 0xfca   :  { %v3563_v63 = vpop.eup %3562 }
 0xfcb   :  { %v2039_v0 = vmul.f32 %v3563_v63, %v4218_v50  ;;  %3333 = vmatmul.mubr.msk.bf16.vlgmr.msra.gmra.mrb[60].mxu1 %vm234_vm2, %v2049_v60  ;;  %v2343_v29 = vpop.permute.xlu1 %2342 }
 0xfcc   :  { %3343 = vmatpush3.bf16.msra.mxu1 %v2300_v1  ;;  %3344 = vmatprep.mubr.msk.bf16.mxu1 %vm3634_vm1, %v3633_v15  ;;  %v2348_v33 = vsel %vm725_vm3, %v2343_v29, 0 }
 0xfcd   :  { %v2050_v21 = vpack.c.bf16 %v2039_v0, %v2039_v0  ;;  %3354 = vmatprep.subr.bf16.mxu1 %v3633_v15 }
 0xfcf   :  { %3339 = vmatmul.mubr.msk.bf16.vlgmr.msra.gmra.mrb[68].mxu0 %vm234_vm2, %v2050_v21 }
 0xfd0   :  { %3349 = vmatpush3.bf16.msra.mxu0 %v2348_v33  ;;  %3350 = vmatprep.mubr.msk.bf16.mxu0 %vm3634_vm1, %v3633_v15 }
 0xfd1   :  { %3360 = vmatprep.subr.bf16.mxu0 %v3633_v15 }
 0xfd2   :  { %v3565_v59 = vpop.eup %3564 }
 0xfd3   :  { %v2043_v2 = vmul.f32 %v3565_v59, %v4223_v51 }
 0xfd5   :  { %v2052_v3 = vpack.c.bf16 %v2043_v2, %v2043_v2 }
 0xfd7   :  { %3351 = vmatmul.mubr.msk.bf16.vlgmr.msra.gmra.mrb[72].mxu0 %vm234_vm2, %v2052_v3 }
 0xfd8   :  { %3364 = vmatprep.mubr.msk.bf16.mxu0 %vm3634_vm1, %v3633_v15  ;;  %3361 = vmatpush3.bf16.msra.mxu0 %v3480_v44  ;;  %v2996_v44 = vld [vmem:[%s4398_s9 + $0x1] ss:$0 sm:$0xff] }
 0xfd9   :  { %3362 = vmatprep.subr.bf16.mxu0 %v3633_v15 }
 0xfdc   :  { %3363 = vmatpush3.bf16.msra.mxu0 %v3481_v47 }
 0xfdd   :  { %3376 = vmatprep.subr.bf16.mxu0 %v3633_v15 }
 0xff0   :  { %v2023_v4 = vpop.xlane.xlu0 %2022 }
 0xff1   :  { %3566 = vrcp.f32 %v2023_v4 }
 0xff4   :  { %v2029_v5 = vpop.xlane.xlu0 %2028 }
 0xff5   :  { %3568 = vrcp.f32 %v2029_v5 }
 0xff8   :  { %v2391_v8 = vpop.permute.xlu0 %2390 }
 0xff9   :  { %v2396_v11 = vsel %vm725_vm3, %v2391_v8, 0 }
 0xffb   :  { %v3567_v6 = vpop.eup %3566 }
 0xffc   :  { %v2041_v7 = vmul.f32 %v3567_v6, %v4233_v34  ;;  %v2989_v6 = vld [vmem:[%s4396_s7 + $0x1] ss:$0 sm:$0xff] }
 0xffe   :  { %v2051_v13 = vpack.c.bf16 %v2041_v7, %v2041_v7 }
 0xfff   :  { %v3569_v9 = vpop.eup %3568 }
0x1000   :  { %3345 = vmatmul.mubr.msk.bf16.vlgmr.msra.gmra.mrb[64].mxu1 %vm234_vm2, %v2051_v13  ;;  %v2045_v36 = vmul.f32 %v3569_v9, %v4237_v37 }
0x1001   :  { %3355 = vmatpush3.bf16.msra.mxu1 %v2396_v11  ;;  %3356 = vmatprep.mubr.msk.bf16.mxu1 %vm3634_vm1, %v3633_v15 }
0x1002   :  { %3368 = vmatprep.subr.bf16.mxu1 %v3633_v15  ;;  %v2053_v17 = vpack.c.bf16 %v2045_v36, %v2045_v36 }
0x1008   :  { %3357 = vmatmul.mubr.msk.bf16.vlgmr.msra.gmra.mrb[68].mxu1 %vm234_vm2, %v2053_v17 }
0x1009   :  { %3372 = vmatprep.mubr.msk.bf16.mxu1 %vm3634_vm1, %v3633_v15 }
0x1041   :  { %v2144_v10 = vpop.f32.mrb[56].mxu1 }
0x1042   :  { %v3322_v61 = vpop.f32.mrb[57].mxu1 }
0x1043   :  { %v2147_v18 = vpop.f32.mrb[58].mxu1 }
0x1044   :  { %v3323_v19 = vpop.f32.mrb[59].mxu1 }
0x1045   :  { %v2096_v20 = vpop.f32.mrb[60].mxu0 }
0x1046   :  { %v3316_v50 = vpop.f32.mrb[61].mxu0 }
0x1047   :  { %v2099_v42 = vpop.f32.mrb[62].mxu0 }
0x1048   :  { %v3317_v51 = vpop.f32.mrb[63].mxu0 }
0x109a   :  { %v2192_v16 = vpop.f32.mrb[64].mxu0 }
0x109b   :  { %v3328_v22 = vpop.f32.mrb[65].mxu0 }
0x109c   :  { %v2195_v23 = vpop.f32.mrb[66].mxu0 }
0x109d   :  { %v3329_v24 = vpop.f32.mrb[67].mxu0 }
0x109e   :  { %v2240_v26 = vpop.f32.mrb[60].mxu1 }
0x109f   :  { %v3453_v27 = vpack.i.bf16 %v2240_v26, %v2192_v16  ;;  %v3334_v28 = vpop.f32.mrb[61].mxu1  ;;  %v3483_v26 = vld [vmem:[%s4399_s10 + $0x18] sm:$0xff]  }
0x10a0   :  { %v2243_v56 = vpop.f32.mrb[62].mxu1 }
0x10a1   :  { %3454 = vrot.lane.b32.xlu1 %v3453_v27, %s3640_s19  ;;  %v3335_v34 = vpop.f32.mrb[63].mxu1  ;;  %s4417_s19 = smov 24  }
0x10a2   :  { %v2288_v30 = vpop.f32.mrb[68].mxu0 }
0x10a3   :  { %v3340_v35 = vpop.f32.mrb[69].mxu0 }
0x10a4   :  { %v2291_v37 = vpop.f32.mrb[70].mxu0 }
0x10a5   :  { %v3341_v43 = vpop.f32.mrb[71].mxu0 }
0x10aa   :  { %v2384_v25 = vpop.f32.mrb[72].mxu0 }
0x10ab   :  { %v3352_v38 = vpop.f32.mrb[73].mxu0 }
0x10ac   :  { %v2387_v39 = vpop.f32.mrb[74].mxu0 }
0x10ad   :  { %v3353_v40 = vpop.f32.mrb[75].mxu0 }
0x10d3   :  { %v2336_v45 = vpop.f32.mrb[64].mxu1 }
0x10d4   :  { %v3458_v48 = vpack.i.bf16 %v2336_v45, %v2288_v30  ;;  %v3346_v49 = vpop.f32.mrb[65].mxu1 }
0x10d5   :  { %v2339_v31 = vpop.f32.mrb[66].mxu1 }
0x10d6   :  { %3459 = vrot.lane.b32.xlu0 %v3458_v48, %s3641_s2  ;;  %v3347_v32 = vpop.f32.mrb[67].mxu1  ;;  %v3484_v31 = vld [vmem:[%s4401_s12 + $0x20] sm:$0xff]  }
0x10d7   :  { %v3485_v32 = vld [vmem:[%s4401_s12 + $0x28] sm:$0xff]  }
0x10db   :  { %v2432_v52 = vpop.f32.mrb[68].mxu1 }
0x10dc   :  { %v3463_v53 = vpack.i.bf16 %v2432_v52, %v2384_v25  ;;  %v3358_v54 = vpop.f32.mrb[69].mxu1  ;;  %v2995_v25 = vld [vmem:[%s4397_s8 + $0x1] ss:$0 sm:$0xff]  ;;  %v3486_v52 = vld [vmem:[%s4401_s12 + $0x30] sm:$0xff]  }
0x10dd   :  { %v2435_v57 = vpop.f32.mrb[70].mxu1  ;;  %v3002_v54 = vld [vmem:[%s4400_s11 + $0x1] ss:$0 sm:$0xff] }
0x10de   :  { %3464 = vrot.lane.b32.xlu1 %v3463_v53, %s4417_s19  ;;  %v3359_v55 = vpop.f32.mrb[71].mxu1  ;;  %v3487_v53 = vld [vmem:[%s4401_s12 + $0x38] sm:$0xff]  }
0x1113   :  { %v3455_v58 = vpop.permute.xlu1 %3454 }
0x1114   :  { %v3457_v46 = vunpack.i.h.bf16 %v3455_v58  ;;  %v3456_v41 = vunpack.i.l.bf16 %v3455_v58 }
0x1116   :  { %v2463_v1 = vsel %vm234_vm2, %v2144_v10, %v3457_v46  ;;  %v2462_v29 = vsel %vm234_vm2, %v2096_v20, %v3456_v41 }
0x1148   :  { %v3460_v62 = vpop.permute.xlu0 %3459 }
0x1149   :  { %v3462_v60 = vunpack.i.h.bf16 %v3460_v62  ;;  %v3461_v63 = vunpack.i.l.bf16 %v3460_v62 }
0x114b   :  { %v2465_v59 = vsel %vm1131_vm4, %v2463_v1, %v3462_v60  ;;  %v2464_v2 = vsel %vm1131_vm4, %v2462_v29, %v3461_v63 }
0x1150   :  { %v3465_v0 = vpop.permute.xlu1 %3464 }
0x1151   :  { %v3467_v21 = vunpack.i.h.bf16 %v3465_v0  ;;  %v3466_v33 = vunpack.i.l.bf16 %v3465_v0 }
0x1153   :  { %v2467_v3 = vsel %vm1134_vm5, %v2465_v59, %v3467_v21  ;;  %v2466_v4 = vsel %vm1134_vm5, %v2464_v2, %v3466_v33 }
0x1154   :  { %v2468_v5 = vpack.c.bf16 %v2467_v3, %v2466_v4 }
0x1156   :  { %3365 = vmatmul.mubr.msk.bf16.vlgmr.msra.gmra.mrb[76].mxu0 %vm79_vm0, %v2468_v5 }
0x1157   :  { %3384 = vmatprep.mubr.msk.bf16.mxu0 %vm3634_vm1, %v3633_v15  ;;  %3377 = vmatpush3.bf16.msra.mxu0 %v3484_v31 }
0x1158   :  { %3378 = vmatprep.subr.bf16.mxu0 %v3633_v15 }
0x115b   :  { %3379 = vmatpush3.bf16.msra.mxu0 %v3485_v32 }
0x115c   :  { %3380 = vmatprep.subr.bf16.mxu0 %v3633_v15 }
0x115f   :  { %3381 = vmatpush3.bf16.msra.mxu0 %v3486_v52 }
0x1160   :  { %3382 = vmatprep.subr.bf16.mxu0 %v3633_v15 }
0x1163   :  { %3383 = vmatpush3.bf16.msra.mxu0 %v3487_v53 }
0x1229   :  { %v2531_v7 = vpop.f32.mrb[76].mxu0 }
0x122a   :  { %v2532_v8 = vadd.f32 %v2989_v6, %v2531_v7  ;;  %v3366_v13 = vpop.f32.mrb[77].mxu0 }
0x122b   :  { %v2534_v9 = vpop.f32.mrb[78].mxu0 }
0x122c   :  { %v2535_v11 = vadd.f32 %v2989_v6, %v2534_v9  ;;  %v3367_v36 = vpop.f32.mrb[79].mxu0  ;;  %v2538_v17 = vadd.f32 %v2532_v8, %v4077_v12 }
0x122e   :  { %v2544_v10 = vsel %vm79_vm0, %v2538_v17, 0.0  ;;  %v2539_v61 = vadd.f32 %v2535_v11, %v4079_v14  ;;  %v3482_v14 = vld [vmem:[%s4399_s10 + $0x10] sm:$0xff]  }
0x122f   :  { %2545 = vadd.xlane.f32.xlu0 %v2544_v10  ;;  %3369 = vmatpush3.bf16.msra.mxu1 %v3482_v14 }
0x1230   :  { %v2547_v18 = vsel %vm79_vm0, %v2539_v61, 0.0  ;;  %3370 = vmatprep.subr.bf16.mxu1 %v3633_v15 }
0x1231   :  { %2548 = vadd.xlane.f32.xlu1 %v2547_v18 }
0x1233   :  { %3371 = vmatpush3.bf16.msra.mxu1 %v3483_v26 }
0x1234   :  { %3388 = vmatprep.subr.bf16.mxu1 %v3633_v15 }
0x12bc   :  { %v2546_v19 = vpop.xlane.xlu0 %2545 }
0x12bd   :  { %v2550_v20 = vmul.f32 0.03125, %v2546_v19 }
0x12be   :  { %v2549_v50 = vpop.xlane.xlu1 %2548 }
0x12bf   :  { %v2552_v42 = vsub.f32 %v2538_v17, %v2550_v20  ;;  %v2551_v51 = vmul.f32 0.03125, %v2549_v50  ;;  %v3015_v17 = vld [vmem:[%s4402_s13 + $0x1] ss:$0 sm:$0xff] }
0x12c1   :  { %v2553_v16 = vsub.f32 %v2539_v61, %v2551_v51  ;;  %v2554_v22 = vmul.f32 %v2552_v42, %v2552_v42 }
0x12c3   :  { %v2556_v23 = vsel %vm79_vm0, %v2554_v22, 0.0  ;;  %v2555_v24 = vmul.f32 %v2553_v16, %v2553_v16 }
0x12c4   :  { %2557 = vadd.xlane.f32.xlu0 %v2556_v23 }
0x12c5   :  { %v2559_v12 = vsel %vm79_vm0, %v2555_v24, 0.0 }
0x12c8   :  { %2560 = vadd.xlane.f32.xlu0 %v2559_v12 }
0x1351   :  { %v2558_v27 = vpop.xlane.xlu0 %2557 }
0x1352   :  { %v2562_v28 = vmul.f32 0.03125, %v2558_v27 }
0x1354   :  { %v2564_v56 = vadd.f32 1e-12, %v2562_v28 }
0x1355   :  { %v2561_v34 = vpop.xlane.xlu0 %2560 }
0x1356   :  { %3570 = vrsqrt.f32 %v2564_v56  ;;  %v2563_v30 = vmul.f32 0.03125, %v2561_v34 }
0x1358   :  { %v2565_v35 = vadd.f32 1e-12, %v2563_v30 }
0x135a   :  { %3572 = vrsqrt.f32 %v2565_v35  ;;  %v3488_v35 = vld [vmem:[%s4405_s16] sm:$0xff]  }
0x1360   :  { %v3571_v37 = vpop.eup %3570 }
0x1361   :  { %v2568_v43 = vmul.f32 %v3571_v37, %v2552_v42  ;;  %v3489_v37 = vld [vmem:[%s4405_s16 + $0x8] sm:$0xff]  }
0x1363   :  { %v2576_v39 = vmul.f32 %v2995_v25, %v2568_v43 }
0x1364   :  { %v3573_v38 = vpop.eup %3572 }
0x1365   :  { %v2569_v40 = vmul.f32 %v3573_v38, %v2553_v16  ;;  %v2584_v47 = vadd.f32 %v2996_v44, %v2576_v39 }
0x1367   :  { %v2577_v45 = vmul.f32 %v2995_v25, %v2569_v40 }
0x1369   :  { %v2585_v48 = vadd.f32 %v2996_v44, %v2577_v45 }
0x136b   :  { %v2586_v49 = vpack.c.bf16 %v2585_v48, %v2584_v47 }
0x136d   :  { %3373 = vmatmul.mubr.msk.bf16.vlgmr.msra.gmra.mrb[72].mxu1 %vm79_vm0, %v2586_v49 }
0x136e   :  { %3392 = vmatprep.mubr.msk.bf16.mxu1 %vm3634_vm1, %v3633_v15  ;;  %3389 = vmatpush3.bf16.msra.mxu1 %v3488_v35 }
0x136f   :  { %3390 = vmatprep.subr.bf16.mxu1 %v3633_v15  ;;  %v3024_v15 = vld [vmem:[%s4404_s15 + $0x1] ss:$0 sm:$0xff] }
0x1372   :  { %3391 = vmatpush3.bf16.msra.mxu1 %v3489_v37 }
0x1440   :  { %v2649_v57 = vpop.f32.mrb[72].mxu1 }
0x1441   :  { %v2650_v55 = vadd.f32 %v3002_v54, %v2649_v57  ;;  %v3374_v58 = vpop.f32.mrb[73].mxu1 }
0x1442   :  { %v2652_v62 = vpop.f32.mrb[74].mxu1 }
0x1443   :  { %v2658_v46 = vmul.f32 0.044715, %v2650_v55  ;;  %v2653_v41 = vadd.f32 %v3002_v54, %v2652_v62  ;;  %v3375_v60 = vpop.f32.mrb[75].mxu1  ;;  %v2656_v7 = vmul.f32 0.5, %v2650_v55 }
0x1445   :  { %v2660_v63 = vmul.f32 %v2658_v46, %v2650_v55  ;;  %v2659_v0 = vmul.f32 0.044715, %v2653_v41  ;;  %v2657_v8 = vmul.f32 0.5, %v2653_v41 }
0x1447   :  { %v2662_v1 = vmul.f32 %v2660_v63, %v2650_v55  ;;  %v2661_v29 = vmul.f32 %v2659_v0, %v2653_v41 }
0x1449   :  { %v2664_v21 = vadd.f32 %v2662_v1, %v2650_v55  ;;  %v2663_v33 = vmul.f32 %v2661_v29, %v2653_v41 }
0x144b   :  { %v2666_v59 = vmul.f32 0.7978846, %v2664_v21  ;;  %v2665_v2 = vadd.f32 %v2663_v33, %v2653_v41 }
0x144d   :  { %3574 = vtanh.f32 %v2666_v59  ;;  %v2667_v3 = vmul.f32 0.7978846, %v2665_v2 }
0x144f   :  { %3576 = vtanh.f32 %v2667_v3 }
0x1457   :  { %v3575_v4 = vpop.eup %3574 }
0x1458   :  { %v2670_v5 = vadd.f32 1.0, %v3575_v4 }
0x1459   :  { %v3577_v6 = vpop.eup %3576 }
0x145a   :  { %v2671_v13 = vadd.f32 1.0, %v3577_v6  ;;  %v2672_v9 = vmul.f32 %v2670_v5, %v2656_v7 }
0x145c   :  { %v2673_v11 = vmul.f32 %v2671_v13, %v2657_v8 }
0x145e   :  { %v2674_v36 = vpack.c.bf16 %v2673_v11, %v2672_v9  ;;  %v3025_v9 = vld [vmem:[%s4406_s17] ss:$0 sm:$0xff] }
0x1460   :  { %3385 = vmatmul.mubr.msk.bf16.vlgmr.msra.gmra.mrb[80].mxu0 %vm1377_vm6, %v2674_v36 }
0x1533   :  { %v2753_v10 = vpop.f32.mrb[80].mxu0 }
0x1534   :  { %v2754_v61 = vadd.f32 %v3015_v17, %v2753_v10  ;;  %v3386_v18 = vpop.f32.mrb[81].mxu0 }
0x1535   :  { %v2756_v19 = vpop.f32.mrb[82].mxu0 }
0x1536   :  { %v2757_v20 = vadd.f32 %v3015_v17, %v2756_v19  ;;  %v3387_v50 = vpop.f32.mrb[83].mxu0  ;;  %v2760_v42 = vadd.f32 %v2754_v61, %v2584_v47  ;;  %v3023_v47 = vld [vmem:[%s4403_s14 + $0x1] ss:$0 sm:$0xff] }
0x1538   :  { %v2766_v51 = vsel %vm79_vm0, %v2760_v42, 0.0  ;;  %v2761_v16 = vadd.f32 %v2757_v20, %v2585_v48 }
0x1539   :  { %2767 = vadd.xlane.f32.xlu0 %v2766_v51 }
0x153a   :  { %v2769_v22 = vsel %vm79_vm0, %v2761_v16, 0.0 }
0x153b   :  { %2770 = vadd.xlane.f32.xlu1 %v2769_v22 }
0x15c6   :  { %v2768_v23 = vpop.xlane.xlu0 %2767 }
0x15c7   :  { %v2772_v24 = vmul.f32 0.03125, %v2768_v23 }
0x15c8   :  { %v2771_v12 = vpop.xlane.xlu1 %2770 }
0x15c9   :  { %v2774_v14 = vsub.f32 %v2760_v42, %v2772_v24  ;;  %v2773_v26 = vmul.f32 0.03125, %v2771_v12 }
0x15cb   :  { %v2775_v27 = vsub.f32 %v2761_v16, %v2773_v26  ;;  %v2776_v28 = vmul.f32 %v2774_v14, %v2774_v14 }
0x15cd   :  { %v2778_v56 = vsel %vm79_vm0, %v2776_v28, 0.0  ;;  %v2777_v34 = vmul.f32 %v2775_v27, %v2775_v27 }
0x15ce   :  { %2779 = vadd.xlane.f32.xlu0 %v2778_v56 }
0x15cf   :  { %v2781_v30 = vsel %vm79_vm0, %v2777_v34, 0.0 }
0x15d0   :  { %2782 = vadd.xlane.f32.xlu1 %v2781_v30 }
0x165b   :  { %v2780_v43 = vpop.xlane.xlu0 %2779 }
0x165c   :  { %v2784_v25 = vmul.f32 0.03125, %v2780_v43 }
0x165d   :  { %v2783_v38 = vpop.xlane.xlu1 %2782 }
0x165e   :  { %v2786_v39 = vadd.f32 1e-12, %v2784_v25  ;;  %v2785_v40 = vmul.f32 0.03125, %v2783_v38 }
0x1660   :  { %3578 = vrsqrt.f32 %v2786_v39  ;;  %v2787_v44 = vadd.f32 1e-12, %v2785_v40 }
0x1662   :  { %3580 = vrsqrt.f32 %v2787_v44 }
0x166a   :  { %v3579_v45 = vpop.eup %3578 }
0x166b   :  { %v2790_v48 = vmul.f32 %v3579_v45, %v2774_v14 }
0x166c   :  { %v3581_v49 = vpop.eup %3580 }
0x166d   :  { %v2798_v31 = vmul.f32 %v3023_v47, %v2790_v48  ;;  %v2791_v32 = vmul.f32 %v3581_v49, %v2775_v27 }
0x166f   :  { %v2806_v52 = vadd.f32 %v3024_v15, %v2798_v31  ;;  %v2799_v53 = vmul.f32 %v3023_v47, %v2791_v32 }
0x1671   :  { %v2808_v54 = vsel %vm79_vm0, %v2806_v52, 0.0  ;;  %v2807_v57 = vadd.f32 %v3024_v15, %v2799_v53 }
0x1672   :  { %v2809_v55 = vrot.slane %v2808_v54, 4 }
0x1673   :  { %v2815_v58 = vsel %vm79_vm0, %v2807_v57, 0.0 }
0x1674   :  { %v2810_v62 = vadd.f32 %v2809_v55, %v2808_v54  ;;  %v2816_v46 = vrot.slane %v2815_v58, 4 }
0x1676   :  { %v2811_v41 = vrot.slane %v2810_v62, 2  ;;  %v2817_v60 = vadd.f32 %v2816_v46, %v2815_v58 }
0x1678   :  { %v2818_v63 = vrot.slane %v2817_v60, 2  ;;  %v2812_v0 = vadd.f32 %v2811_v41, %v2810_v62 }
0x167a   :  { %v2813_v1 = vrot.slane %v2812_v0, 1  ;;  %v2819_v29 = vadd.f32 %v2818_v63, %v2817_v60 }
0x167c   :  { %v2814_v21 = vadd.f32 %v2813_v1, %v2812_v0  ;;  %v2820_v33 = vrot.slane %v2819_v29, 1 }
0x167e   :  { %v2821_v59 = vadd.f32 %v2820_v33, %v2819_v29  ;;  %v2823_v2 = vmul.f32 0.125, %v2814_v21 }
0x1680   :  { %v2824_v3 = vmul.f32 0.125, %v2821_v59  ;;  %v2825_v4 = vpack.c.bf16 %v2823_v2, %v2823_v2 }
0x1682   :  { %v2826_v5 = vpack.c.bf16 %v2824_v3, %v2824_v3  ;;  %v2840_v6 = vunpack.c.l.b16 %v2825_v4 }
0x1684   :  { %v2841_v7 = vunpack.c.l.b16 %v2826_v5 }
0x1686   :  { %v2843_v8 = vsel %vm2842_vm7, %v2841_v7, %v2840_v6 }
0x1687   :  { %v2844_v13 = vpack.c.b16 %v2843_v8, %v2843_v8 }
0x1689   :  { %3393 = vmatmul.mubr.msk.bf16.vlgmr.msra.gmra.mrb[76].mxu1 %vm79_vm0, %v2844_v13 }
0x175c   :  { %v2894_v11 = vpop.f32.mrb[76].mxu1 }
0x175d   :  { %v2895_v36 = vadd.f32 %v3025_v9, %v2894_v11  ;;  %v3394_v17 = vpop.f32.mrb[77].mxu1 }
0x175e   :  { %v2897_v10 = vpop.f32.mrb[78].mxu1 }
0x175f   :  { %v3395_v61 = vpop.f32.mrb[79].mxu1  ;;  %2901 = vst.msk [vmem:[#allocation5] sm:$0x3] %vm2900_vm8, %v2895_v36 }
0x1760   :  { %3617 = shalt.err (!%p3614_p12)
}
0x1761   :  { %s3618_s17 = scalar_lea.hbm %s4407_s18, 32 }
0x1762   :  { %p3619_p13 = scmp.ne.s32.totalorder %s4407_s18, %s3618_s17  ;;  %p3622_p0 = scmp.lt.u32.totalorder %s3618_s17, %s4407_s18 }
0x1764   :  { %p3624_p1 = pnand %p3622_p0, %p3619_p13 }
0x1766   :  { %3627 = shalt.err (!%p3624_p1)
}
0x1767   :  { %2911 = dma.vmem_to_hbm [thread:$0]  %s2909_s0, 32, %s4407_s18, [#allocation4]  }
0x1768   :  { %3630 = dma.done.wait [#allocation4], 32  }
0x1769   :  { %3631 = vsyncadd [#allocation4], 4294967264 }
0x176a   :  { %2915 = vsyncpa [#allocation3], 1 }
0x176b   :  { %2916 = vsyncpa [#allocation4], 1 }

</bundles_post_ra>
